<compile_context>
chip_gen: v5e
topology: v5e:2x2
jax: 0.10.0
libtpu: 0.0.40
codegen_flags: <defaults>
</compile_context>

<pallas_src>
import functools

import jax
import jax.numpy as jnp
from jax import lax
from jax.experimental import pallas as pl
from jax.experimental.pallas import tpu as pltpu

F32 = jnp.float32
BF16 = jnp.bfloat16
VMEM = pltpu.MemorySpace.VMEM

LN_EPS = 1e-12
A_PAD = 128          # LoRA-A (2r) columns padded to a full lane width

_VMEM_LIMIT = None


def _vmem_limit_bytes():
    """64 MiB scoped budget on v5e/v6e (128 MiB physical), 32 MiB on v7x."""
    global _VMEM_LIMIT
    if _VMEM_LIMIT is None:
        try:
            kind = jax.devices()[0].device_kind.lower()
        except Exception:
            kind = ""
        _VMEM_LIMIT = (32 << 20) if "v7" in kind else (64 << 20)
    return _VMEM_LIMIT


def _cparams(*sem):
    return pltpu.CompilerParams(
        dimension_semantics=sem if sem else None,
        vmem_limit_bytes=_vmem_limit_bytes(),
    )


# ------------------------- in-kernel math helpers -------------------------


def _ln(z, g, b):
    mu = jnp.mean(z, axis=-1, keepdims=True)
    var = jnp.mean((z - mu) * (z - mu), axis=-1, keepdims=True)
    return (z - mu) * lax.rsqrt(var + LN_EPS) * g + b


def _gelu(y):
    # tanh-approx GELU  # TODO(synk): HF BERT uses the exact erf-based gelu.
    return 0.5 * y * (1.0 + jnp.tanh(0.7978845608028654 * (y + 0.044715 * y * y * y)))


# ------------------------- fused encoder-layer kernel -------------------------


def _encoder_layer_kernel(x_ref, mask_ref, iln_g_ref, iln_b_ref,
                          wqkva_ref, bqkv_ref, bblk_ref,
                          wo_ref, bo_ref, ln1_g_ref, ln1_b_ref,
                          wi_ref, bi_ref, wo2_ref, bo2_ref,
                          ln2_g_ref, ln2_b_ref, o_ref,
                          *, num_heads, head_dim, lora_scaling, attn_scale,
                          input_ln):
    H = num_heads * head_dim
    x = x_ref[0].astype(F32)                            # (S, H)
    if input_ln:                                        # embedding LN fused here
        x = _ln(x, iln_g_ref[...], iln_b_ref[...])

    # ---- QKV projection + LoRA down-proj: ONE wide MXU matmul ----
    xb = x.astype(BF16)
    comb = jnp.dot(xb, wqkva_ref[...], preferred_element_type=F32)   # (S, 3H+A_PAD)
    qkv = comb[:, :3 * H] + bqkv_ref[...]                            # lane-aligned slice
    xa = comb[:, 3 * H:].astype(BF16)                                # (S, A_PAD)
    qkv = qkv + lora_scaling * jnp.dot(xa, bblk_ref[...],
                                       preferred_element_type=F32)   # LoRA up-proj (B init = 0)

    # ---- multi-head self-attention, batched over a leading head axis ----
    q_full = qkv[:, :H] * attn_scale                    # fold 1/sqrt(dh) into Q
    k_full = qkv[:, H:2 * H]
    v_full = qkv[:, 2 * H:]

    def heads(z):                                       # (S, H) -> (nh, S, dh)
        return jnp.stack(
            [z[:, h * head_dim:(h + 1) * head_dim] for h in range(num_heads)],
            axis=0)

    q = heads(q_full).astype(BF16)
    k = heads(k_full).astype(BF16)
    v = heads(v_full).astype(BF16)

    s = jnp.einsum('hqd,hkd->hqk', q, k, preferred_element_type=F32)  # (nh, S, S)
    s = s + mask_ref[0][None, :, :]                     # additive mask bias
    s = s - jnp.max(s, axis=-1, keepdims=True)
    p = jnp.exp(s)
    p = p * pl.reciprocal(jnp.sum(p, axis=-1, keepdims=True), approx=True)
    ctx = jnp.einsum('hqk,hkd->hqd', p.astype(BF16), v,
                     preferred_element_type=F32)        # (nh, S, dh)

    # ---- output projection with the head-merge folded in, + residual + LN1 ----
    y = jnp.dot(ctx[0].astype(BF16), wo_ref[0:head_dim, :],
                preferred_element_type=F32)
    for h in range(1, num_heads):                       # static unroll, nh small
        y = y + jnp.dot(ctx[h].astype(BF16),
                        wo_ref[h * head_dim:(h + 1) * head_dim, :],
                        preferred_element_type=F32)
    y = y + bo_ref[...]
    h1 = _ln(y + x, ln1_g_ref[...], ln1_b_ref[...])

    # ---- FFN + residual + LN2 ----
    t = jnp.dot(h1.astype(BF16), wi_ref[...], preferred_element_type=F32) + bi_ref[...]
    t = _gelu(t)                                        # f32 elementwise (v5e-friendly)
    y2 = jnp.dot(t.astype(BF16), wo2_ref[...], preferred_element_type=F32) + bo2_ref[...]
    o_ref[0] = _ln(y2 + h1, ln2_g_ref[...], ln2_b_ref[...]).astype(o_ref.dtype)


def pallas_encoder_layer(x, mask_bias, lyr, *, emb_ln_g, emb_ln_b, input_ln,
                         num_heads, head_dim, lora_scaling):
    B, S, H = x.shape
    ncomb = lyr["w_qkv_a"].shape[1]
    apad = lyr["lora_b_blk"].shape[0]
    threeH = 3 * H
    I = lyr["wi"].shape[1]

    kernel = functools.partial(
        _encoder_layer_kernel,
        num_heads=num_heads, head_dim=head_dim,
        lora_scaling=float(lora_scaling),
        attn_scale=1.0 / (head_dim ** 0.5),
        input_ln=bool(input_ln))

    def full(shape):
        # block-invariant (weights / biases / LN params)
        # TODO(synk): pipeline_mode=pl.Buffered(1) here at real bert-base scale.
        return pl.BlockSpec(shape, lambda b: (0,) * len(shape))

    return pl.pallas_call(
        kernel,
        out_shape=jax.ShapeDtypeStruct((B, S, H), BF16),   # bf16 activation carry
        grid=(B,),
        in_specs=[
            pl.BlockSpec((1, S, H), lambda b: (b, 0, 0)),   # hidden / embeddings
            pl.BlockSpec((1, 1, S), lambda b: (b, 0, 0)),   # additive mask bias
            full((1, H)), full((1, H)),                     # input-LN gamma/beta
            full((H, ncomb)),                               # [Wq|Wk|Wv|LoRA-A pad]
            full((1, threeH)),                              # b_qkv
            full((apad, threeH)),                           # LoRA-B block
            full((H, H)), full((1, H)),                     # Wo, bo
            full((1, H)), full((1, H)),                     # LN1
            full((H, I)), full((1, I)),                     # Wi, bi
            full((I, H)), full((1, H)),                     # Wo2, bo2
            full((1, H)), full((1, H)),                     # LN2
        ],
        out_specs=pl.BlockSpec((1, S, H), lambda b: (b, 0, 0)),
        compiler_params=_cparams("parallel"),
    )(x, mask_bias, emb_ln_g, emb_ln_b,
      lyr["w_qkv_a"], lyr["b_qkv"], lyr["lora_b_blk"],
      lyr["wo"], lyr["bo"], lyr["ln1_g"], lyr["ln1_b"],
      lyr["wi"], lyr["bi"], lyr["wo2"], lyr["bo2"],
      lyr["ln2_g"], lyr["ln2_b"])


# ------------------------- fused pooler + dropout + classifier -------------------------


def _head_kernel(cls_ref, pw_ref, pb_ref, mask_ref, ow_ref, ob_ref, o_ref):
    pooled = jnp.tanh(jnp.dot(cls_ref[...].astype(BF16), pw_ref[...],
                              preferred_element_type=F32) + pb_ref[...])
    dropped = pooled * mask_ref[...]          # precomputed, pre-scaled 1/(1-p)
    o_ref[...] = (jnp.dot(dropped.astype(BF16), ow_ref[...],
                          preferred_element_type=F32) + ob_ref[...]).astype(o_ref.dtype)


def pallas_head(cls, pooler_w, pooler_b, drop_mask, out_w_pad, out_b_pad):
    B = cls.shape[0]
    npad = out_w_pad.shape[1]
    return pl.pallas_call(
        _head_kernel,
        out_shape=jax.ShapeDtypeStruct((B, npad), F32),
        in_specs=[pl.BlockSpec(memory_space=VMEM)] * 6,
        out_specs=pl.BlockSpec(memory_space=VMEM),
        compiler_params=_cparams(),
    )(cls, pooler_w, pooler_b, drop_mask, out_w_pad, out_b_pad)


# ------------------------- Model definition -------------------------

CFG = dict(
    vocab_size=128,
    max_pos=64,
    type_vocab=2,
    hidden=128,        # lane-dense scaled-down BERT (real bert-base: 768)
    num_heads=4,
    head_dim=32,
    intermediate=512,  # 4 * hidden
    num_layers=2,
    lora_r=8,
    lora_alpha=8,
    n_classes=3,
    dropout_p=0.3,
)

N_PAD = 128  # classifier output padded to a full lane width


def init_params(key, cfg):
    H, I, r = cfg["hidden"], cfg["intermediate"], cfg["lora_r"]

    def nrm(k, shape, std=0.02):
        return std * jax.random.normal(k, shape, dtype=F32)

    keys = iter(jax.random.split(key, 16 + 16 * cfg["num_layers"]))
    p = {
        "word_emb": nrm(next(keys), (cfg["vocab_size"], H)),
        "pos_emb": nrm(next(keys), (cfg["max_pos"], H)),
        "type_emb": nrm(next(keys), (cfg["type_vocab"], H)),
        "emb_ln_g": jnp.ones((1, H), F32),
        "emb_ln_b": jnp.zeros((1, H), F32),
        "pooler_w": nrm(next(keys), (H, H)).astype(BF16),
        "pooler_b": jnp.zeros((1, H), F32),
        "layers": [],
    }
    out_w = nrm(next(keys), (H, cfg["n_classes"]))
    p["out_w_pad"] = (
        jnp.zeros((H, N_PAD), F32).at[:, : cfg["n_classes"]].set(out_w).astype(BF16)
    )
    p["out_b_pad"] = jnp.zeros((1, N_PAD), F32)

    for _ in range(cfg["num_layers"]):
        wq, wk, wv = (nrm(next(keys), (H, H)) for _ in range(3))
        aq, av = (nrm(next(keys), (H, r), std=1.0 / r) for _ in range(2))
        # LoRA-A columns ride inside the fused QKV weight, lane-padded to A_PAD.
        a_pad = jnp.zeros((H, A_PAD), F32).at[:, :r].set(aq).at[:, r:2 * r].set(av)
        w_qkv_a = jnp.concatenate([wq, wk, wv, a_pad], axis=1)     # (H, 3H + A_PAD)
        # LoRA up-proj block: rows 0:r -> Q columns, rows r:2r -> V columns,
        # remaining pad rows zero.  PEFT init: lora_B = 0 (kept explicit zeros).
        b_blk = jnp.zeros((A_PAD, 3 * H), F32)
        lyr = {
            "w_qkv_a": w_qkv_a.astype(BF16),
            "b_qkv": jnp.zeros((1, 3 * H), F32),
            "lora_b_blk": b_blk.astype(BF16),
            "wo": nrm(next(keys), (H, H)).astype(BF16),
            "bo": jnp.zeros((1, H), F32),
            "ln1_g": jnp.ones((1, H), F32),
            "ln1_b": jnp.zeros((1, H), F32),
            "wi": nrm(next(keys), (H, I)).astype(BF16),
            "bi": jnp.zeros((1, I), F32),
            "wo2": nrm(next(keys), (I, H)).astype(BF16),
            "bo2": jnp.zeros((1, H), F32),
            "ln2_g": jnp.ones((1, H), F32),
            "ln2_b": jnp.zeros((1, H), F32),
        }
        p["layers"].append(lyr)
    return p


def peft_bert_base_forward(params, input_ids, attention_mask, token_type_ids,
                           dropout_key=None, cfg=CFG):
    B, S = input_ids.shape
    H = cfg["hidden"]
    nh = cfg["num_heads"]
    dh = cfg["head_dim"]
    scaling = cfg["lora_alpha"] / (cfg["lora_r"] ** 0.5)   # use_rslora=True -> alpha/sqrt(r)

    # --- embeddings (gathers are glue); embedding-LN is fused into layer 0 ---
    we = params["word_emb"][input_ids]                     # [B,S,H]
    pe = params["pos_emb"][:S][None, :, :]                 # [1,S,H]
    te = params["type_emb"][token_type_ids]                # [B,S,H]
    h = (we + pe + te).astype(F32)                         # [B,S,H] (pre-LN)

    # additive attention-mask bias, [B,1,S] (folded into the fused layer kernel)
    mask_bias = ((1.0 - attention_mask.astype(F32)) * -1e9)[:, None, :]

    for li, lyr in enumerate(params["layers"]):
        h = pallas_encoder_layer(
            h, mask_bias, lyr,
            emb_ln_g=params["emb_ln_g"], emb_ln_b=params["emb_ln_b"],
            input_ln=(li == 0),
            num_heads=nh, head_dim=dh, lora_scaling=scaling)   # -> bf16 [B,S,H]

    # --- pooled output (CLS), then fused pooler + dropout + classifier ---
    cls = h[:, 0, :]                                       # [B,H] bf16
    if dropout_key is None:
        drop_mask = jnp.ones((B, H), F32)                  # eval: identity
    else:
        keep = jax.random.bernoulli(dropout_key, 1.0 - cfg["dropout_p"], (B, H))
        drop_mask = keep.astype(F32) / (1.0 - cfg["dropout_p"])
    logits_pad = pallas_head(cls, params["pooler_w"], params["pooler_b"],
                             drop_mask, params["out_w_pad"], params["out_b_pad"])
    return logits_pad[:, : cfg["n_classes"]]


# ------------------------- main -------------------------

if __name__ == "__main__":
    root = jax.random.PRNGKey(0)
    pkey, ikey, dkey = jax.random.split(root, 3)
    params = init_params(pkey, CFG)

    B, S = 2, 8
    input_ids = jax.random.randint(ikey, (B, S), 0, CFG["vocab_size"], dtype=jnp.int32)
    attention_mask = jnp.ones((B, S), dtype=jnp.int32)
    token_type_ids = jnp.zeros((B, S), dtype=jnp.int32)

    logits = peft_bert_base_forward(params, input_ids, attention_mask,
                                    token_type_ids, dropout_key=dkey)
    jax.block_until_ready(logits)
    assert logits.shape == (B, CFG["n_classes"])
    assert bool(jnp.all(jnp.isfinite(logits)))
    print("KERNEL_OK")
</pallas_src>

<mosaic_0001>
module attributes {stable_mosaic.version = 11 : i64} {
  func.func @_encoder_layer_kernel(%arg0: i32, %arg1: memref<1x8x128xf32, #tpu.memory_space<vmem>>, %arg2: memref<1x1x8xf32, #tpu.memory_space<vmem>>, %arg3: memref<1x128xf32, #tpu.memory_space<vmem>>, %arg4: memref<1x128xf32, #tpu.memory_space<vmem>>, %arg5: memref<128x512xbf16, #tpu.memory_space<vmem>>, %arg6: memref<1x384xf32, #tpu.memory_space<vmem>>, %arg7: memref<128x384xbf16, #tpu.memory_space<vmem>>, %arg8: memref<128x128xbf16, #tpu.memory_space<vmem>>, %arg9: memref<1x128xf32, #tpu.memory_space<vmem>>, %arg10: memref<1x128xf32, #tpu.memory_space<vmem>>, %arg11: memref<1x128xf32, #tpu.memory_space<vmem>>, %arg12: memref<128x512xbf16, #tpu.memory_space<vmem>>, %arg13: memref<1x512xf32, #tpu.memory_space<vmem>>, %arg14: memref<512x128xbf16, #tpu.memory_space<vmem>>, %arg15: memref<1x128xf32, #tpu.memory_space<vmem>>, %arg16: memref<1x128xf32, #tpu.memory_space<vmem>>, %arg17: memref<1x128xf32, #tpu.memory_space<vmem>>, %arg18: memref<1x8x128xbf16, #tpu.memory_space<vmem>>) attributes {dimension_semantics = [#tpu.dimension_semantics<parallel>], iteration_bounds = array<i64: 2>, scalar_prefetch = 0 : i64, scratch_operands = 0 : i64, tpu.core_type = #tpu.core_type<tc>, window_params = [{transform_indices = @transform_0, window_bounds = array<i64: 1, 8, 128>}, {transform_indices = @transform_1, window_bounds = array<i64: 1, 1, 8>}, {pipeline_mode = #tpu.pipeline_mode<synchronous>, transform_indices = @transform_2, window_bounds = array<i64: 1, 128>}, {pipeline_mode = #tpu.pipeline_mode<synchronous>, transform_indices = @transform_3, window_bounds = array<i64: 1, 128>}, {pipeline_mode = #tpu.pipeline_mode<synchronous>, transform_indices = @transform_4, window_bounds = array<i64: 128, 512>}, {pipeline_mode = #tpu.pipeline_mode<synchronous>, transform_indices = @transform_5, window_bounds = array<i64: 1, 384>}, {pipeline_mode = #tpu.pipeline_mode<synchronous>, transform_indices = @transform_6, window_bounds = array<i64: 128, 384>}, {pipeline_mode = #tpu.pipeline_mode<synchronous>, transform_indices = @transform_7, window_bounds = array<i64: 128, 128>}, {pipeline_mode = #tpu.pipeline_mode<synchronous>, transform_indices = @transform_8, window_bounds = array<i64: 1, 128>}, {pipeline_mode = #tpu.pipeline_mode<synchronous>, transform_indices = @transform_9, window_bounds = array<i64: 1, 128>}, {pipeline_mode = #tpu.pipeline_mode<synchronous>, transform_indices = @transform_10, window_bounds = array<i64: 1, 128>}, {pipeline_mode = #tpu.pipeline_mode<synchronous>, transform_indices = @transform_11, window_bounds = array<i64: 128, 512>}, {pipeline_mode = #tpu.pipeline_mode<synchronous>, transform_indices = @transform_12, window_bounds = array<i64: 1, 512>}, {pipeline_mode = #tpu.pipeline_mode<synchronous>, transform_indices = @transform_13, window_bounds = array<i64: 512, 128>}, {pipeline_mode = #tpu.pipeline_mode<synchronous>, transform_indices = @transform_14, window_bounds = array<i64: 1, 128>}, {pipeline_mode = #tpu.pipeline_mode<synchronous>, transform_indices = @transform_15, window_bounds = array<i64: 1, 128>}, {pipeline_mode = #tpu.pipeline_mode<synchronous>, transform_indices = @transform_16, window_bounds = array<i64: 1, 128>}, {transform_indices = @transform_17, window_bounds = array<i64: 1, 8, 128>}]} {
    %c0 = arith.constant 0 : index
    %c0_0 = arith.constant 0 : index
    %c0_1 = arith.constant 0 : index
    %0 = vector.load %arg1[%c0, %c0_0, %c0_1] : memref<1x8x128xf32, #tpu.memory_space<vmem>>, vector<1x8x128xf32>
    %1 = vector.shape_cast %0 : vector<1x8x128xf32> to vector<8x128xf32>
    %c0_2 = arith.constant 0 : index
    %c0_3 = arith.constant 0 : index
    %2 = vector.load %arg3[%c0_2, %c0_3] : memref<1x128xf32, #tpu.memory_space<vmem>>, vector<1x128xf32>
    %c0_4 = arith.constant 0 : index
    %c0_5 = arith.constant 0 : index
    %3 = vector.load %arg4[%c0_4, %c0_5] : memref<1x128xf32, #tpu.memory_space<vmem>>, vector<1x128xf32>
    %cst = arith.constant dense<0.000000e+00> : vector<8xf32>
    %4 = vector.multi_reduction <add>, %1, %cst [1] : vector<8x128xf32> to vector<8xf32>
    %5 = vector.shape_cast %4 : vector<8xf32> to vector<8x1xf32>
    %cst_6 = arith.constant 1.280000e+02 : f32
    %6 = vector.broadcast %cst_6 : f32 to vector<8x1xf32>
    %7 = arith.divf %5, %6 : vector<8x1xf32>
    %8 = vector.broadcast %7 : vector<8x1xf32> to vector<8x128xf32>
    %9 = arith.subf %1, %8 : vector<8x128xf32>
    %10 = vector.broadcast %7 : vector<8x1xf32> to vector<8x128xf32>
    %11 = arith.subf %1, %10 : vector<8x128xf32>
    %12 = arith.mulf %9, %11 : vector<8x128xf32>
    %cst_7 = arith.constant dense<0.000000e+00> : vector<8xf32>
    %13 = vector.multi_reduction <add>, %12, %cst_7 [1] : vector<8x128xf32> to vector<8xf32>
    %14 = vector.shape_cast %13 : vector<8xf32> to vector<8x1xf32>
    %cst_8 = arith.constant 1.280000e+02 : f32
    %15 = vector.broadcast %cst_8 : f32 to vector<8x1xf32>
    %16 = arith.divf %14, %15 : vector<8x1xf32>
    %17 = vector.broadcast %7 : vector<8x1xf32> to vector<8x128xf32>
    %18 = arith.subf %1, %17 : vector<8x128xf32>
    %cst_9 = arith.constant 9.99999996E-13 : f32
    %19 = vector.broadcast %cst_9 : f32 to vector<8x1xf32>
    %20 = arith.addf %16, %19 : vector<8x1xf32>
    %21 = math.rsqrt %20 : vector<8x1xf32>
    %22 = vector.broadcast %21 : vector<8x1xf32> to vector<8x128xf32>
    %23 = arith.mulf %18, %22 : vector<8x128xf32>
    %24 = vector.broadcast %2 : vector<1x128xf32> to vector<8x128xf32>
    %25 = arith.mulf %23, %24 : vector<8x128xf32>
    %26 = vector.broadcast %3 : vector<1x128xf32> to vector<8x128xf32>
    %27 = arith.addf %25, %26 : vector<8x128xf32>
    %28 = arith.truncf %27 : vector<8x128xf32> to vector<8x128xbf16>
    %c0_10 = arith.constant 0 : index
    %c0_11 = arith.constant 0 : index
    %29 = vector.load %arg5[%c0_10, %c0_11] : memref<128x512xbf16, #tpu.memory_space<vmem>>, vector<128x512xbf16>
    %cst_12 = arith.constant dense<0.000000e+00> : vector<8x512xf32>
    %30 = tpu.matmul %28, %29, %cst_12 {dimension_numbers = #tpu.dot_dimension_numbers<[1], [0], [0], [1], [0, 0, 1, 1], [], []>} : vector<8x128xbf16>, vector<128x512xbf16>, vector<8x512xf32> -> vector<8x512xf32>
    %31 = vector.extract_strided_slice %30 {offsets = [0, 0], sizes = [8, 384], strides = [1, 1]} : vector<8x512xf32> to vector<8x384xf32>
    %c0_13 = arith.constant 0 : index
    %c0_14 = arith.constant 0 : index
    %32 = vector.load %arg6[%c0_13, %c0_14] : memref<1x384xf32, #tpu.memory_space<vmem>>, vector<1x384xf32>
    %33 = vector.broadcast %32 : vector<1x384xf32> to vector<8x384xf32>
    %34 = arith.addf %31, %33 : vector<8x384xf32>
    %35 = vector.extract_strided_slice %30 {offsets = [0, 384], sizes = [8, 128], strides = [1, 1]} : vector<8x512xf32> to vector<8x128xf32>
    %36 = arith.truncf %35 : vector<8x128xf32> to vector<8x128xbf16>
    %c0_15 = arith.constant 0 : index
    %c0_16 = arith.constant 0 : index
    %37 = vector.load %arg7[%c0_15, %c0_16] : memref<128x384xbf16, #tpu.memory_space<vmem>>, vector<128x384xbf16>
    %cst_17 = arith.constant dense<0.000000e+00> : vector<8x384xf32>
    %38 = tpu.matmul %36, %37, %cst_17 {dimension_numbers = #tpu.dot_dimension_numbers<[1], [0], [0], [1], [0, 0, 1, 1], [], []>} : vector<8x128xbf16>, vector<128x384xbf16>, vector<8x384xf32> -> vector<8x384xf32>
    %cst_18 = arith.constant 2.82842708 : f32
    %39 = vector.broadcast %cst_18 : f32 to vector<8x384xf32>
    %40 = arith.mulf %39, %38 : vector<8x384xf32>
    %41 = arith.addf %34, %40 : vector<8x384xf32>
    %42 = vector.extract_strided_slice %41 {offsets = [0, 0], sizes = [8, 128], strides = [1, 1]} : vector<8x384xf32> to vector<8x128xf32>
    %cst_19 = arith.constant 0.176776692 : f32
    %43 = vector.broadcast %cst_19 : f32 to vector<8x128xf32>
    %44 = arith.mulf %42, %43 : vector<8x128xf32>
    %45 = vector.extract_strided_slice %41 {offsets = [0, 128], sizes = [8, 128], strides = [1, 1]} : vector<8x384xf32> to vector<8x128xf32>
    %46 = vector.extract_strided_slice %41 {offsets = [0, 256], sizes = [8, 128], strides = [1, 1]} : vector<8x384xf32> to vector<8x128xf32>
    %47 = vector.extract_strided_slice %44 {offsets = [0, 0], sizes = [8, 32], strides = [1, 1]} : vector<8x128xf32> to vector<8x32xf32>
    %48 = vector.extract_strided_slice %44 {offsets = [0, 32], sizes = [8, 32], strides = [1, 1]} : vector<8x128xf32> to vector<8x32xf32>
    %49 = vector.extract_strided_slice %44 {offsets = [0, 64], sizes = [8, 32], strides = [1, 1]} : vector<8x128xf32> to vector<8x32xf32>
    %50 = vector.extract_strided_slice %44 {offsets = [0, 96], sizes = [8, 32], strides = [1, 1]} : vector<8x128xf32> to vector<8x32xf32>
    %51 = vector.shape_cast %47 : vector<8x32xf32> to vector<1x8x32xf32>
    %52 = vector.shape_cast %48 : vector<8x32xf32> to vector<1x8x32xf32>
    %53 = vector.shape_cast %49 : vector<8x32xf32> to vector<1x8x32xf32>
    %54 = vector.shape_cast %50 : vector<8x32xf32> to vector<1x8x32xf32>
    %55 = tpu.concatenate %51, %52, %53, %54 in 0 : vector<1x8x32xf32>, vector<1x8x32xf32>, vector<1x8x32xf32>, vector<1x8x32xf32> -> vector<4x8x32xf32>
    %56 = arith.truncf %55 : vector<4x8x32xf32> to vector<4x8x32xbf16>
    %57 = vector.extract_strided_slice %45 {offsets = [0, 0], sizes = [8, 32], strides = [1, 1]} : vector<8x128xf32> to vector<8x32xf32>
    %58 = vector.extract_strided_slice %45 {offsets = [0, 32], sizes = [8, 32], strides = [1, 1]} : vector<8x128xf32> to vector<8x32xf32>
    %59 = vector.extract_strided_slice %45 {offsets = [0, 64], sizes = [8, 32], strides = [1, 1]} : vector<8x128xf32> to vector<8x32xf32>
    %60 = vector.extract_strided_slice %45 {offsets = [0, 96], sizes = [8, 32], strides = [1, 1]} : vector<8x128xf32> to vector<8x32xf32>
    %61 = vector.shape_cast %57 : vector<8x32xf32> to vector<1x8x32xf32>
    %62 = vector.shape_cast %58 : vector<8x32xf32> to vector<1x8x32xf32>
    %63 = vector.shape_cast %59 : vector<8x32xf32> to vector<1x8x32xf32>
    %64 = vector.shape_cast %60 : vector<8x32xf32> to vector<1x8x32xf32>
    %65 = tpu.concatenate %61, %62, %63, %64 in 0 : vector<1x8x32xf32>, vector<1x8x32xf32>, vector<1x8x32xf32>, vector<1x8x32xf32> -> vector<4x8x32xf32>
    %66 = arith.truncf %65 : vector<4x8x32xf32> to vector<4x8x32xbf16>
    %67 = vector.extract_strided_slice %46 {offsets = [0, 0], sizes = [8, 32], strides = [1, 1]} : vector<8x128xf32> to vector<8x32xf32>
    %68 = vector.extract_strided_slice %46 {offsets = [0, 32], sizes = [8, 32], strides = [1, 1]} : vector<8x128xf32> to vector<8x32xf32>
    %69 = vector.extract_strided_slice %46 {offsets = [0, 64], sizes = [8, 32], strides = [1, 1]} : vector<8x128xf32> to vector<8x32xf32>
    %70 = vector.extract_strided_slice %46 {offsets = [0, 96], sizes = [8, 32], strides = [1, 1]} : vector<8x128xf32> to vector<8x32xf32>
    %71 = vector.shape_cast %67 : vector<8x32xf32> to vector<1x8x32xf32>
    %72 = vector.shape_cast %68 : vector<8x32xf32> to vector<1x8x32xf32>
    %73 = vector.shape_cast %69 : vector<8x32xf32> to vector<1x8x32xf32>
    %74 = vector.shape_cast %70 : vector<8x32xf32> to vector<1x8x32xf32>
    %75 = tpu.concatenate %71, %72, %73, %74 in 0 : vector<1x8x32xf32>, vector<1x8x32xf32>, vector<1x8x32xf32>, vector<1x8x32xf32> -> vector<4x8x32xf32>
    %76 = arith.truncf %75 : vector<4x8x32xf32> to vector<4x8x32xbf16>
    "tpu.trace_start"() <{level = 10 : i32, message = "hqd,hkd->hqk"}> : () -> ()
    %cst_20 = arith.constant dense<0.000000e+00> : vector<4x8x8xf32>
    %77 = tpu.matmul %56, %66, %cst_20 {dimension_numbers = #tpu.dot_dimension_numbers<[2], [2], [1], [1], [0, 0, 0, 1, 1, 1], [0], [0]>} : vector<4x8x32xbf16>, vector<4x8x32xbf16>, vector<4x8x8xf32> -> vector<4x8x8xf32>
    "tpu.trace_stop"() : () -> ()
    %c0_21 = arith.constant 0 : index
    %c0_22 = arith.constant 0 : index
    %c0_23 = arith.constant 0 : index
    %78 = vector.load %arg2[%c0_21, %c0_22, %c0_23] : memref<1x1x8xf32, #tpu.memory_space<vmem>>, vector<1x1x8xf32>
    %79 = vector.shape_cast %78 : vector<1x1x8xf32> to vector<1x8xf32>
    %80 = vector.shape_cast %79 : vector<1x8xf32> to vector<1x1x8xf32>
    %81 = vector.broadcast %80 : vector<1x1x8xf32> to vector<4x8x8xf32>
    %82 = arith.addf %77, %81 : vector<4x8x8xf32>
    %cst_24 = arith.constant dense<0xFF800000> : vector<4x8xf32>
    %83 = vector.multi_reduction <maximumf>, %82, %cst_24 [2] : vector<4x8x8xf32> to vector<4x8xf32>
    %84 = vector.shape_cast %83 : vector<4x8xf32> to vector<4x8x1xf32>
    %85 = vector.broadcast %84 : vector<4x8x1xf32> to vector<4x8x8xf32>
    %86 = arith.subf %82, %85 : vector<4x8x8xf32>
    %87 = math.exp %86 : vector<4x8x8xf32>
    %cst_25 = arith.constant dense<0.000000e+00> : vector<4x8xf32>
    %88 = vector.multi_reduction <add>, %87, %cst_25 [2] : vector<4x8x8xf32> to vector<4x8xf32>
    %89 = vector.shape_cast %88 : vector<4x8xf32> to vector<4x8x1xf32>
    %90 = tpu.reciprocal %89 {approx = true} : vector<4x8x1xf32> -> vector<4x8x1xf32>
    %91 = vector.broadcast %90 : vector<4x8x1xf32> to vector<4x8x8xf32>
    %92 = arith.mulf %87, %91 : vector<4x8x8xf32>
    %93 = arith.truncf %92 : vector<4x8x8xf32> to vector<4x8x8xbf16>
    "tpu.trace_start"() <{level = 10 : i32, message = "hqk,hkd->hqd"}> : () -> ()
    %cst_26 = arith.constant dense<0.000000e+00> : vector<4x8x32xf32>
    %94 = tpu.matmul %93, %76, %cst_26 {dimension_numbers = #tpu.dot_dimension_numbers<[2], [1], [1], [2], [0, 0, 0, 1, 1, 2], [0], [0]>} : vector<4x8x8xbf16>, vector<4x8x32xbf16>, vector<4x8x32xf32> -> vector<4x8x32xf32>
    "tpu.trace_stop"() : () -> ()
    %95 = vector.extract_strided_slice %94 {offsets = [0, 0, 0], sizes = [1, 8, 32], strides = [1, 1, 1]} : vector<4x8x32xf32> to vector<1x8x32xf32>
    %96 = vector.shape_cast %95 : vector<1x8x32xf32> to vector<8x32xf32>
    %97 = arith.truncf %96 : vector<8x32xf32> to vector<8x32xbf16>
    %c0_27 = arith.constant 0 : index
    %c0_28 = arith.constant 0 : index
    %98 = vector.load %arg8[%c0_27, %c0_28] : memref<128x128xbf16, #tpu.memory_space<vmem>>, vector<32x128xbf16>
    %cst_29 = arith.constant dense<0.000000e+00> : vector<8x128xf32>
    %99 = tpu.matmul %97, %98, %cst_29 {dimension_numbers = #tpu.dot_dimension_numbers<[1], [0], [0], [1], [0, 0, 1, 1], [], []>} : vector<8x32xbf16>, vector<32x128xbf16>, vector<8x128xf32> -> vector<8x128xf32>
    %100 = vector.extract_strided_slice %94 {offsets = [1, 0, 0], sizes = [1, 8, 32], strides = [1, 1, 1]} : vector<4x8x32xf32> to vector<1x8x32xf32>
    %101 = vector.shape_cast %100 : vector<1x8x32xf32> to vector<8x32xf32>
    %102 = arith.truncf %101 : vector<8x32xf32> to vector<8x32xbf16>
    %c32 = arith.constant 32 : index
    %c0_30 = arith.constant 0 : index
    %103 = vector.load %arg8[%c32, %c0_30] : memref<128x128xbf16, #tpu.memory_space<vmem>>, vector<32x128xbf16>
    %cst_31 = arith.constant dense<0.000000e+00> : vector<8x128xf32>
    %104 = tpu.matmul %102, %103, %cst_31 {dimension_numbers = #tpu.dot_dimension_numbers<[1], [0], [0], [1], [0, 0, 1, 1], [], []>} : vector<8x32xbf16>, vector<32x128xbf16>, vector<8x128xf32> -> vector<8x128xf32>
    %105 = arith.addf %99, %104 : vector<8x128xf32>
    %106 = vector.extract_strided_slice %94 {offsets = [2, 0, 0], sizes = [1, 8, 32], strides = [1, 1, 1]} : vector<4x8x32xf32> to vector<1x8x32xf32>
    %107 = vector.shape_cast %106 : vector<1x8x32xf32> to vector<8x32xf32>
    %108 = arith.truncf %107 : vector<8x32xf32> to vector<8x32xbf16>
    %c64 = arith.constant 64 : index
    %c0_32 = arith.constant 0 : index
    %109 = vector.load %arg8[%c64, %c0_32] : memref<128x128xbf16, #tpu.memory_space<vmem>>, vector<32x128xbf16>
    %cst_33 = arith.constant dense<0.000000e+00> : vector<8x128xf32>
    %110 = tpu.matmul %108, %109, %cst_33 {dimension_numbers = #tpu.dot_dimension_numbers<[1], [0], [0], [1], [0, 0, 1, 1], [], []>} : vector<8x32xbf16>, vector<32x128xbf16>, vector<8x128xf32> -> vector<8x128xf32>
    %111 = arith.addf %105, %110 : vector<8x128xf32>
    %112 = vector.extract_strided_slice %94 {offsets = [3, 0, 0], sizes = [1, 8, 32], strides = [1, 1, 1]} : vector<4x8x32xf32> to vector<1x8x32xf32>
    %113 = vector.shape_cast %112 : vector<1x8x32xf32> to vector<8x32xf32>
    %114 = arith.truncf %113 : vector<8x32xf32> to vector<8x32xbf16>
    %c96 = arith.constant 96 : index
    %c0_34 = arith.constant 0 : index
    %115 = vector.load %arg8[%c96, %c0_34] : memref<128x128xbf16, #tpu.memory_space<vmem>>, vector<32x128xbf16>
    %cst_35 = arith.constant dense<0.000000e+00> : vector<8x128xf32>
    %116 = tpu.matmul %114, %115, %cst_35 {dimension_numbers = #tpu.dot_dimension_numbers<[1], [0], [0], [1], [0, 0, 1, 1], [], []>} : vector<8x32xbf16>, vector<32x128xbf16>, vector<8x128xf32> -> vector<8x128xf32>
    %117 = arith.addf %111, %116 : vector<8x128xf32>
    %c0_36 = arith.constant 0 : index
    %c0_37 = arith.constant 0 : index
    %118 = vector.load %arg9[%c0_36, %c0_37] : memref<1x128xf32, #tpu.memory_space<vmem>>, vector<1x128xf32>
    %119 = vector.broadcast %118 : vector<1x128xf32> to vector<8x128xf32>
    %120 = arith.addf %117, %119 : vector<8x128xf32>
    %121 = arith.addf %120, %27 : vector<8x128xf32>
    %c0_38 = arith.constant 0 : index
    %c0_39 = arith.constant 0 : index
    %122 = vector.load %arg10[%c0_38, %c0_39] : memref<1x128xf32, #tpu.memory_space<vmem>>, vector<1x128xf32>
    %c0_40 = arith.constant 0 : index
    %c0_41 = arith.constant 0 : index
    %123 = vector.load %arg11[%c0_40, %c0_41] : memref<1x128xf32, #tpu.memory_space<vmem>>, vector<1x128xf32>
    %cst_42 = arith.constant dense<0.000000e+00> : vector<8xf32>
    %124 = vector.multi_reduction <add>, %121, %cst_42 [1] : vector<8x128xf32> to vector<8xf32>
    %125 = vector.shape_cast %124 : vector<8xf32> to vector<8x1xf32>
    %cst_43 = arith.constant 1.280000e+02 : f32
    %126 = vector.broadcast %cst_43 : f32 to vector<8x1xf32>
    %127 = arith.divf %125, %126 : vector<8x1xf32>
    %128 = vector.broadcast %127 : vector<8x1xf32> to vector<8x128xf32>
    %129 = arith.subf %121, %128 : vector<8x128xf32>
    %130 = vector.broadcast %127 : vector<8x1xf32> to vector<8x128xf32>
    %131 = arith.subf %121, %130 : vector<8x128xf32>
    %132 = arith.mulf %129, %131 : vector<8x128xf32>
    %cst_44 = arith.constant dense<0.000000e+00> : vector<8xf32>
    %133 = vector.multi_reduction <add>, %132, %cst_44 [1] : vector<8x128xf32> to vector<8xf32>
    %134 = vector.shape_cast %133 : vector<8xf32> to vector<8x1xf32>
    %cst_45 = arith.constant 1.280000e+02 : f32
    %135 = vector.broadcast %cst_45 : f32 to vector<8x1xf32>
    %136 = arith.divf %134, %135 : vector<8x1xf32>
    %137 = vector.broadcast %127 : vector<8x1xf32> to vector<8x128xf32>
    %138 = arith.subf %121, %137 : vector<8x128xf32>
    %cst_46 = arith.constant 9.99999996E-13 : f32
    %139 = vector.broadcast %cst_46 : f32 to vector<8x1xf32>
    %140 = arith.addf %136, %139 : vector<8x1xf32>
    %141 = math.rsqrt %140 : vector<8x1xf32>
    %142 = vector.broadcast %141 : vector<8x1xf32> to vector<8x128xf32>
    %143 = arith.mulf %138, %142 : vector<8x128xf32>
    %144 = vector.broadcast %122 : vector<1x128xf32> to vector<8x128xf32>
    %145 = arith.mulf %143, %144 : vector<8x128xf32>
    %146 = vector.broadcast %123 : vector<1x128xf32> to vector<8x128xf32>
    %147 = arith.addf %145, %146 : vector<8x128xf32>
    %148 = arith.truncf %147 : vector<8x128xf32> to vector<8x128xbf16>
    %c0_47 = arith.constant 0 : index
    %c0_48 = arith.constant 0 : index
    %149 = vector.load %arg12[%c0_47, %c0_48] : memref<128x512xbf16, #tpu.memory_space<vmem>>, vector<128x512xbf16>
    %cst_49 = arith.constant dense<0.000000e+00> : vector<8x512xf32>
    %150 = tpu.matmul %148, %149, %cst_49 {dimension_numbers = #tpu.dot_dimension_numbers<[1], [0], [0], [1], [0, 0, 1, 1], [], []>} : vector<8x128xbf16>, vector<128x512xbf16>, vector<8x512xf32> -> vector<8x512xf32>
    %c0_50 = arith.constant 0 : index
    %c0_51 = arith.constant 0 : index
    %151 = vector.load %arg13[%c0_50, %c0_51] : memref<1x512xf32, #tpu.memory_space<vmem>>, vector<1x512xf32>
    %152 = vector.broadcast %151 : vector<1x512xf32> to vector<8x512xf32>
    %153 = arith.addf %150, %152 : vector<8x512xf32>
    %cst_52 = arith.constant 5.000000e-01 : f32
    %154 = vector.broadcast %cst_52 : f32 to vector<8x512xf32>
    %155 = arith.mulf %154, %153 : vector<8x512xf32>
    %cst_53 = arith.constant 4.471500e-02 : f32
    %156 = vector.broadcast %cst_53 : f32 to vector<8x512xf32>
    %157 = arith.mulf %156, %153 : vector<8x512xf32>
    %158 = arith.mulf %157, %153 : vector<8x512xf32>
    %159 = arith.mulf %158, %153 : vector<8x512xf32>
    %160 = arith.addf %153, %159 : vector<8x512xf32>
    %cst_54 = arith.constant 0.797884583 : f32
    %161 = vector.broadcast %cst_54 : f32 to vector<8x512xf32>
    %162 = arith.mulf %161, %160 : vector<8x512xf32>
    %163 = math.tanh %162 : vector<8x512xf32>
    %cst_55 = arith.constant 1.000000e+00 : f32
    %164 = vector.broadcast %cst_55 : f32 to vector<8x512xf32>
    %165 = arith.addf %164, %163 : vector<8x512xf32>
    %166 = arith.mulf %155, %165 : vector<8x512xf32>
    %167 = arith.truncf %166 : vector<8x512xf32> to vector<8x512xbf16>
    %c0_56 = arith.constant 0 : index
    %c0_57 = arith.constant 0 : index
    %168 = vector.load %arg14[%c0_56, %c0_57] : memref<512x128xbf16, #tpu.memory_space<vmem>>, vector<512x128xbf16>
    %cst_58 = arith.constant dense<0.000000e+00> : vector<8x128xf32>
    %169 = tpu.matmul %167, %168, %cst_58 {dimension_numbers = #tpu.dot_dimension_numbers<[1], [0], [0], [1], [0, 0, 1, 1], [], []>} : vector<8x512xbf16>, vector<512x128xbf16>, vector<8x128xf32> -> vector<8x128xf32>
    %c0_59 = arith.constant 0 : index
    %c0_60 = arith.constant 0 : index
    %170 = vector.load %arg15[%c0_59, %c0_60] : memref<1x128xf32, #tpu.memory_space<vmem>>, vector<1x128xf32>
    %171 = vector.broadcast %170 : vector<1x128xf32> to vector<8x128xf32>
    %172 = arith.addf %169, %171 : vector<8x128xf32>
    %173 = arith.addf %172, %147 : vector<8x128xf32>
    %c0_61 = arith.constant 0 : index
    %c0_62 = arith.constant 0 : index
    %174 = vector.load %arg16[%c0_61, %c0_62] : memref<1x128xf32, #tpu.memory_space<vmem>>, vector<1x128xf32>
    %c0_63 = arith.constant 0 : index
    %c0_64 = arith.constant 0 : index
    %175 = vector.load %arg17[%c0_63, %c0_64] : memref<1x128xf32, #tpu.memory_space<vmem>>, vector<1x128xf32>
    %cst_65 = arith.constant dense<0.000000e+00> : vector<8xf32>
    %176 = vector.multi_reduction <add>, %173, %cst_65 [1] : vector<8x128xf32> to vector<8xf32>
    %177 = vector.shape_cast %176 : vector<8xf32> to vector<8x1xf32>
    %cst_66 = arith.constant 1.280000e+02 : f32
    %178 = vector.broadcast %cst_66 : f32 to vector<8x1xf32>
    %179 = arith.divf %177, %178 : vector<8x1xf32>
    %180 = vector.broadcast %179 : vector<8x1xf32> to vector<8x128xf32>
    %181 = arith.subf %173, %180 : vector<8x128xf32>
    %182 = vector.broadcast %179 : vector<8x1xf32> to vector<8x128xf32>
    %183 = arith.subf %173, %182 : vector<8x128xf32>
    %184 = arith.mulf %181, %183 : vector<8x128xf32>
    %cst_67 = arith.constant dense<0.000000e+00> : vector<8xf32>
    %185 = vector.multi_reduction <add>, %184, %cst_67 [1] : vector<8x128xf32> to vector<8xf32>
    %186 = vector.shape_cast %185 : vector<8xf32> to vector<8x1xf32>
    %cst_68 = arith.constant 1.280000e+02 : f32
    %187 = vector.broadcast %cst_68 : f32 to vector<8x1xf32>
    %188 = arith.divf %186, %187 : vector<8x1xf32>
    %189 = vector.broadcast %179 : vector<8x1xf32> to vector<8x128xf32>
    %190 = arith.subf %173, %189 : vector<8x128xf32>
    %cst_69 = arith.constant 9.99999996E-13 : f32
    %191 = vector.broadcast %cst_69 : f32 to vector<8x1xf32>
    %192 = arith.addf %188, %191 : vector<8x1xf32>
    %193 = math.rsqrt %192 : vector<8x1xf32>
    %194 = vector.broadcast %193 : vector<8x1xf32> to vector<8x128xf32>
    %195 = arith.mulf %190, %194 : vector<8x128xf32>
    %196 = vector.broadcast %174 : vector<1x128xf32> to vector<8x128xf32>
    %197 = arith.mulf %195, %196 : vector<8x128xf32>
    %198 = vector.broadcast %175 : vector<1x128xf32> to vector<8x128xf32>
    %199 = arith.addf %197, %198 : vector<8x128xf32>
    %200 = arith.truncf %199 : vector<8x128xf32> to vector<8x128xbf16>
    %c0_70 = arith.constant 0 : index
    %c0_71 = arith.constant 0 : index
    %c0_72 = arith.constant 0 : index
    %201 = vector.load %arg18[%c0_70, %c0_71, %c0_72] : memref<1x8x128xbf16, #tpu.memory_space<vmem>>, vector<1x8x128xbf16>
    %202 = vector.shape_cast %201 : vector<1x8x128xbf16> to vector<8x128xbf16>
    %203 = vector.shape_cast %200 : vector<8x128xbf16> to vector<1x8x128xbf16>
    tpu.vector_store %arg18[%c0_70, %c0_71, %c0_72], %203 {strides = array<i32>} : memref<1x8x128xbf16, #tpu.memory_space<vmem>>, vector<1x8x128xbf16>,
    return
  }
  func.func @transform_0(%arg0: i32) -> (i32, i32, i32) {
    %c0_i32 = arith.constant 0 : i32
    %c0_i32_0 = arith.constant 0 : i32
    %c0_i32_1 = arith.constant 0 : i32
    return %arg0, %c0_i32, %c0_i32_0 : i32, i32, i32
  }
  func.func @transform_1(%arg0: i32) -> (i32, i32, i32) {
    %c0_i32 = arith.constant 0 : i32
    %c0_i32_0 = arith.constant 0 : i32
    %c0_i32_1 = arith.constant 0 : i32
    return %arg0, %c0_i32, %c0_i32_0 : i32, i32, i32
  }
  func.func @transform_2(%arg0: i32) -> (i32, i32) {
    %c0_i32 = arith.constant 0 : i32
    %c0_i32_0 = arith.constant 0 : i32
    %c0_i32_1 = arith.constant 0 : i32
    return %c0_i32, %c0_i32_0 : i32, i32
  }
  func.func @transform_3(%arg0: i32) -> (i32, i32) {
    %c0_i32 = arith.constant 0 : i32
    %c0_i32_0 = arith.constant 0 : i32
    %c0_i32_1 = arith.constant 0 : i32
    return %c0_i32, %c0_i32_0 : i32, i32
  }
  func.func @transform_4(%arg0: i32) -> (i32, i32) {
    %c0_i32 = arith.constant 0 : i32
    %c0_i32_0 = arith.constant 0 : i32
    %c0_i32_1 = arith.constant 0 : i32
    return %c0_i32, %c0_i32_0 : i32, i32
  }
  func.func @transform_5(%arg0: i32) -> (i32, i32) {
    %c0_i32 = arith.constant 0 : i32
    %c0_i32_0 = arith.constant 0 : i32
    %c0_i32_1 = arith.constant 0 : i32
    return %c0_i32, %c0_i32_0 : i32, i32
  }
  func.func @transform_6(%arg0: i32) -> (i32, i32) {
    %c0_i32 = arith.constant 0 : i32
    %c0_i32_0 = arith.constant 0 : i32
    %c0_i32_1 = arith.constant 0 : i32
    return %c0_i32, %c0_i32_0 : i32, i32
  }
  func.func @transform_7(%arg0: i32) -> (i32, i32) {
    %c0_i32 = arith.constant 0 : i32
    %c0_i32_0 = arith.constant 0 : i32
    %c0_i32_1 = arith.constant 0 : i32
    return %c0_i32, %c0_i32_0 : i32, i32
  }
  func.func @transform_8(%arg0: i32) -> (i32, i32) {
    %c0_i32 = arith.constant 0 : i32
    %c0_i32_0 = arith.constant 0 : i32
    %c0_i32_1 = arith.constant 0 : i32
    return %c0_i32, %c0_i32_0 : i32, i32
  }
  func.func @transform_9(%arg0: i32) -> (i32, i32) {
    %c0_i32 = arith.constant 0 : i32
    %c0_i32_0 = arith.constant 0 : i32
    %c0_i32_1 = arith.constant 0 : i32
    return %c0_i32, %c0_i32_0 : i32, i32
  }
  func.func @transform_10(%arg0: i32) -> (i32, i32) {
    %c0_i32 = arith.constant 0 : i32
    %c0_i32_0 = arith.constant 0 : i32
    %c0_i32_1 = arith.constant 0 : i32
    return %c0_i32, %c0_i32_0 : i32, i32
  }
  func.func @transform_11(%arg0: i32) -> (i32, i32) {
    %c0_i32 = arith.constant 0 : i32
    %c0_i32_0 = arith.constant 0 : i32
    %c0_i32_1 = arith.constant 0 : i32
    return %c0_i32, %c0_i32_0 : i32, i32
  }
  func.func @transform_12(%arg0: i32) -> (i32, i32) {
    %c0_i32 = arith.constant 0 : i32
    %c0_i32_0 = arith.constant 0 : i32
    %c0_i32_1 = arith.constant 0 : i32
    return %c0_i32, %c0_i32_0 : i32, i32
  }
  func.func @transform_13(%arg0: i32) -> (i32, i32) {
    %c0_i32 = arith.constant 0 : i32
    %c0_i32_0 = arith.constant 0 : i32
    %c0_i32_1 = arith.constant 0 : i32
    return %c0_i32, %c0_i32_0 : i32, i32
  }
  func.func @transform_14(%arg0: i32) -> (i32, i32) {
    %c0_i32 = arith.constant 0 : i32
    %c0_i32_0 = arith.constant 0 : i32
    %c0_i32_1 = arith.constant 0 : i32
    return %c0_i32, %c0_i32_0 : i32, i32
  }
  func.func @transform_15(%arg0: i32) -> (i32, i32) {
    %c0_i32 = arith.constant 0 : i32
    %c0_i32_0 = arith.constant 0 : i32
    %c0_i32_1 = arith.constant 0 : i32
    return %c0_i32, %c0_i32_0 : i32, i32
  }
  func.func @transform_16(%arg0: i32) -> (i32, i32) {
    %c0_i32 = arith.constant 0 : i32
    %c0_i32_0 = arith.constant 0 : i32
    %c0_i32_1 = arith.constant 0 : i32
    return %c0_i32, %c0_i32_0 : i32, i32
  }
  func.func @transform_17(%arg0: i32) -> (i32, i32, i32) {
    %c0_i32 = arith.constant 0 : i32
    %c0_i32_0 = arith.constant 0 : i32
    %c0_i32_1 = arith.constant 0 : i32
    return %arg0, %c0_i32, %c0_i32_0 : i32, i32, i32
  }
}

</mosaic_0001>

<bundles_post_ra>
// kernel: tpu_custom_call.1
= control target key start
LH: loop header
LB: loop body
LE: loop exit
PB: predicated region body
PF: predicated region fallthrough
CT: control target
= control target key end

     0   :  { %s4162_s0 = inlined_call_operand.hbm [shape: f32[2,8,128], index: 0, kind: input, shape index: {}]   ;;  %s4163_s1 = inlined_call_operand.hbm [shape: f32[2,1,8], index: 1, kind: input, shape index: {}]   ;;  %s4164_s2 = inlined_call_operand.hbm [shape: f32[1,128], index: 2, kind: input, shape index: {}]   ;;  %s4165_s3 = inlined_call_operand.hbm [shape: f32[1,128], index: 3, kind: input, shape index: {}]   ;;  %s4166_s4 = inlined_call_operand.hbm [shape: bf16[128,512], index: 4, kind: input, shape index: {}]   ;;  %s4167_s5 = inlined_call_operand.vmem [shape: f32[1,384], index: 5, kind: input, shape index: {}]   ;;  %s4168_s6 = inlined_call_operand.hbm [shape: bf16[128,384], index: 6, kind: input, shape index: {}]   ;;  %s4169_s7 = inlined_call_operand.hbm [shape: bf16[128,128], index: 7, kind: input, shape index: {}]   ;;  %s4170_s8 = inlined_call_operand.hbm [shape: f32[1,128], index: 8, kind: input, shape index: {}]   ;;  %s4171_s9 = inlined_call_operand.vmem [shape: f32[1,128], index: 9, kind: input, shape index: {}]   ;;  %s4172_s10 = inlined_call_operand.vmem [shape: f32[1,128], index: 10, kind: input, shape index: {}]   ;;  %s4173_s11 = inlined_call_operand.hbm [shape: bf16[128,512], index: 11, kind: input, shape index: {}]   ;;  %s4174_s12 = inlined_call_operand.vmem [shape: f32[1,512], index: 12, kind: input, shape index: {}]   ;;  %s4175_s13 = inlined_call_operand.hbm [shape: bf16[512,128], index: 13, kind: input, shape index: {}]   ;;  %s4176_s14 = inlined_call_operand.vmem [shape: f32[1,128], index: 14, kind: input, shape index: {}]   ;;  %s4177_s15 = inlined_call_operand.vmem [shape: f32[1,128], index: 15, kind: input, shape index: {}]   ;;  %s4178_s16 = inlined_call_operand.vmem [shape: f32[1,128], index: 16, kind: input, shape index: {}]   ;;  %s4179_s17 = inlined_call_operand.hbm [shape: bf16[2,8,128], index: 17, kind: output, shape index: {}]  }
   0x1   :  { %4184 = sst [smem:[#allocation30_spill]] %s4162_s0 }
   0x2   :  { %4185 = sst [smem:[#allocation31_spill]] %s4163_s1 }
   0x3   :  { %4186 = sst [smem:[#allocation32_spill]] %s4164_s2 }
   0x4   :  { %4187 = sst [smem:[#allocation33_spill]] %s4165_s3 }
   0x5   :  { %4188 = sst [smem:[#allocation34_spill]] %s4166_s4 }
   0x6   :  { %4189 = sst [smem:[#allocation35_spill]] %s4168_s6 }
   0x7   :  { %4190 = sst [smem:[#allocation36_spill]] %s4169_s7 }
   0x8   :  { %4191 = sst [smem:[#allocation37_spill]] %s4170_s8 }
   0x9   :  { %4192 = sst [smem:[#allocation38_spill]] %s4173_s11 }
   0xa   :  { %4193 = sst [smem:[#allocation39_spill]] %s4174_s12 }
   0xb   :  { %4194 = sst [smem:[#allocation40_spill]] %s4175_s13 }
   0xc   :  { %4195 = sst [smem:[#allocation41_spill]] %s4176_s14 }
   0xd   :  { %4196 = sst [smem:[#allocation42_spill]] %s4177_s15 }
   0xe   :  { %4197 = sst [smem:[#allocation43_spill]] %s4178_s16 }
   0xf   :  { %4198 = sst [smem:[#allocation44_spill]] %s4179_s17 }
  0x10   :  { %22 = vsyncpa [#allocation3], 0 }
  0x11   :  { %24 = vsyncpa [#allocation3 + $0x1], 0 }
  0x12   :  { %25 = vsyncpa [#allocation6], 0 }
  0x13   :  { %27 = vsyncpa [#allocation6 + $0x1], 0 }
  0x14   :  { %28 = vsyncpa [#allocation9], 0 }
  0x15   :  { %29 = vsyncpa [#allocation12], 0 }
  0x16   :  { %30 = vsyncpa [#allocation15], 0 }
  0x17   :  { %31 = vsyncpa [#allocation18], 0 }
  0x18   :  { %32 = vsyncpa [#allocation4], 0 }
  0x19   :  { %34 = vsyncpa [#allocation4 + $0x1], 0  ;;  %s3832_s24 = smov 0   ;;  %s3834_s25 = smov 0  }
  0x1a   :  { %s3836_s26 = smov 0   ;;  %s3838_s27 = smov 0  }
  0x1b LB: > { %4199 = sst [smem:[#allocation28_spill]] %s3718_s26  ;;  %s3856_s30 = sadd.s32 4294967295, %s3722_s27   ;;  %s3722_s27 = sphi %s3838_s27, %s4228_s27   ;;  %s3718_s26 = sphi %s3836_s26, %s4225_s26   ;;  %s3714_s25 = sphi %s3834_s25, %s4227_s25   ;;  %s3710_s24 = sphi %s3832_s24, %s4226_s24  }
  0x1c   : > { %s4200_s2 = sld [smem:[#allocation32_spill]]  ;;  %p2470_p0 = scmp.ge.s32.totalorder %s3722_s27, 1 }
  0x1d   : > { %p61_p1 = scmp.eq.s32.totalorder %s3856_s30, 0  ;;  %p438_p2 = scmp.lt.s32.totalorder %s3722_s27, 3 }
  0x1e   : > { %s3724_s19 = smov [#allocation7]   ;;  %s4202_s3 = sld [smem:[#allocation33_spill]] }
  0x1f   : > { %p3861_p3 = pnand %p2470_p0, %p438_p2  ;;  %s452_s1 = sshll.u32 %s3724_s19, 4  ;;  %s453_s1 = int_to_ptr.vmem [resolvable:$true] %s452_s1 }
  0x20   : > { %s3725_s28 = smov [#allocation8]   ;;  %s4204_s6 = sld [smem:[#allocation35_spill]] }
  0x21   : > { %p3187_p5 = pneg %p3861_p3  ;;  %s464_s29 = sshll.u32 %s3725_s28, 4  ;;  %s465_s29 = int_to_ptr.vmem [resolvable:$true] %s464_s29 }
  0x22   : > { %s450_s0 = sshll.u32 %s4200_s2, 4  ;;  %s3726_s20 = smov [#allocation11]   ;;  %s451_s0 = int_to_ptr.hbm [resolvable:$true] %s450_s0 }
  0x23   : > { %p3873_p6 = pnand %p3187_p5, %p61_p1  ;;  %s492_s21 = sshll.u32 %s3726_s20, 4  ;;  %s493_s21 = int_to_ptr.vmem [resolvable:$true] %s492_s21 }
  0x24   : > { %s462_s22 = sshll.u32 %s4202_s3, 4  ;;  %s4205_s8 = sld [smem:[#allocation37_spill]]  ;;  %s463_s22 = int_to_ptr.hbm [resolvable:$true] %s462_s22 }
  0x25   : > { %3190 = dma.hbm_to_vmem [thread:$0]  (!%p3873_p6), %s451_s0, 16, %s453_s1, [#allocation6]  }
  0x26   : > { %s490_s17 = sshll.u32 %s4204_s6, 4  ;;  %s3727_s14 = smov 192   ;;  %s491_s17 = int_to_ptr.hbm [resolvable:$true] %s490_s17 }
  0x27   : > { %3193 = dma.hbm_to_vmem [thread:$0]  (!%p3873_p6), %s463_s22, 16, %s465_s29, [#allocation9]  }
  0x28   : > { %s3728_s28 = smov 12   ;;  %s3729_s2 = smov [#allocation14]  }
  0x29   : > { %3199 = dma.hbm_to_vmem [thread:$0]  (!%p3873_p6), %s491_s17, 3072, %s493_s21, [#allocation12], %s3727_s14, %s3727_s14, %s3728_s28  }
  0x2a   : > { %s519_s15 = sshll.u32 %s4205_s8, 4  ;;  %s521_s19 = sshll.u32 %s3729_s2, 4  ;;  %s520_s15 = int_to_ptr.hbm [resolvable:$true] %s519_s15  ;;  %s522_s19 = int_to_ptr.vmem [resolvable:$true] %s521_s19 }
  0x2b   : > { %s4206_s4 = sld [smem:[#allocation34_spill]]  ;;  %s3730_s1 = smov [#allocation10]  }
  0x2c   : > { %3205 = dma.hbm_to_vmem [thread:$0]  (!%p3873_p6), %s520_s15, 16, %s522_s19, [#allocation15]  }
  0x2d   : > { %s475_s3 = sshll.u32 %s3730_s1, 4  ;;  %s4207_s7 = sld [smem:[#allocation36_spill]]  ;;  %s476_s3 = int_to_ptr.vmem [resolvable:$true] %s475_s3 }
  0x2e   : > { %s3731_s14 = smov 256   ;;  %s3732_s17 = smov 16  }
  0x2f   : > { %s3733_s6 = smov [#allocation13]   ;;  %s3734_s20 = smov 64  }
  0x30   : > { %s506_s12 = sshll.u32 %s3733_s6, 4  ;;  %s3735_s15 = smov 4   ;;  %s507_s12 = int_to_ptr.vmem [resolvable:$true] %s506_s12 }
  0x31   : > { %s473_s0 = sshll.u32 %s4206_s4, 4  ;;  %s4208_s11 = sld [smem:[#allocation38_spill]]  ;;  %s474_s0 = int_to_ptr.hbm [resolvable:$true] %s473_s0 }
  0x32   : > { %3196 = dma.hbm_to_vmem [thread:$0]  (!%p3873_p6), %s474_s0, 4096, %s476_s3, [#allocation9], %s3731_s14, %s3731_s14, %s3732_s17  }
  0x33   : > { %s504_s29 = sshll.u32 %s4207_s7, 4  ;;  %s3736_s19 = smov [#allocation16]   ;;  %s505_s29 = int_to_ptr.hbm [resolvable:$true] %s504_s29 }
  0x34   : > { %3202 = dma.hbm_to_vmem [thread:$0]  (!%p3873_p6), %s505_s29, 1024, %s507_s12, [#allocation12], %s3734_s20, %s3734_s20, %s3735_s15  }
  0x35   : > { %s538_s0 = sshll.u32 %s3736_s19, 4  ;;  %s4209_s13 = sld [smem:[#allocation40_spill]]  ;;  %s539_s0 = int_to_ptr.vmem [resolvable:$true] %s538_s0 }
  0x36   : > { %s3737_s22 = smov [#allocation17]   ;;  %s2469_s6 = sadd.s32 4294967294, %s3722_s27  }
  0x37   : > { %s536_s2 = sshll.u32 %s4208_s11, 4  ;;  %s555_s29 = sshll.u32 %s3737_s22, 4  ;;  %s537_s2 = int_to_ptr.hbm [resolvable:$true] %s536_s2  ;;  %s556_s29 = int_to_ptr.vmem [resolvable:$true] %s555_s29 }
  0x38   : > { %3208 = dma.hbm_to_vmem [thread:$0]  (!%p3873_p6), %s537_s2, 4096, %s539_s0, [#allocation15], %s3731_s14, %s3731_s14, %s3732_s17  }
  0x39   : > { %s3913_s12 = sadd.s32 1, %s3722_s27   ;;  %s47_s28 = sadd.s32 1, %s3718_s26 }
  0x3a   : > { %s44_s21 = ssub.s32 %s3722_s27, %s3913_s12  ;;  %p54_p8 = scmp.ne.s32.totalorder %s3718_s26, %s3714_s25 }
  0x3b   : > { %s553_s16 = sshll.u32 %s4209_s13, 4  ;;  %p45_p7 = scmp.eq.s32.totalorder %s44_s21, 0  ;;  %s554_s16 = int_to_ptr.hbm [resolvable:$true] %s553_s16 }
  0x3c   : > { %3211 = dma.hbm_to_vmem [thread:$0]  (!%p3873_p6), %s554_s16, 4096, %s556_s29, [#allocation18], %s3734_s20, %s3734_s20, %s3735_s15  }
  0x3d   : > { %p55_p9 = scmp.eq.s32.totalorder %s3722_s27, 0  ;;  %p60_p10 = scmp.ne.s32.totalorder %s3714_s25, %s3710_s24 }
  0x3e   : > { %s3924_s14 = scalar_select %p45_p7, %s3718_s26, %s47_s28  }
  0x3f   : > { %p3926_p11 = por %p55_p9, %p54_p8  ;;  %p3932_p12 = por %p61_p1, %p60_p10 }
  0x40   : > { %4210 = sst [smem:[#allocation29_spill]] %s3924_s14  ;;  %p425_p13 = scmp.eq.s32.totalorder %s3856_s30, 1 }
  0x41   : > { %p431_p0 = scmp.eq.s32.totalorder %s2469_s6, 1  ;;  %p3231_p2 = scmp.lt.s32.totalorder %s3722_s27, 2 }
  0x42   : > { %s3939_s20 = sand.u32 1, %s3718_s26   ;;  %p3941_p5 = por %p425_p13, %p54_p8 }
  0x43   : > { %p3945_p6 = por %p431_p0, %p60_p10  ;;  %s2480_s19 = sshll.u32 %s3939_s20, 3 }
  0x44   : > { %s2481_s0 = sshll.u32 %s3722_s27, 3  ;;  %s4215_s16 = sld [smem:[#allocation30_spill]] }
  0x45   : > { %s582_s29 = scalar_lea.vmem [#allocation2], %s2480_s19  ;;  %p3956_p7 = pnand %p3231_p2, %p3926_p11 }
  0x46   : > { %s590_s6 = sshll.u32 %s582_s29, 4  ;;  %s597_s4 = sand.u32 1, %s3722_s27   ;;  %s591_s6 = int_to_ptr.vmem [resolvable:$true] %s590_s6 }
  0x47   : > { %s579_s7 = scalar_lea.sflag [#allocation3], %s3939_s20  ;;  %p3576_p9 = pneg %p3956_p7 }
  0x4a   : > { %s586_s22 = scalar_lea.hbm %s4215_s16, %s2481_s0  ;;  %s3579_s0 = scalar_lea.hbm %s4215_s16, 16 }
  0x4b   : > { %s588_s21 = sshll.u32 %s586_s22, 4  ;;  %s589_s21 = int_to_ptr.hbm [resolvable:$true] %s588_s21 }
  0x4c   : > { %s3572_s8 = sshra.s32 %s589_s21, 4  ;;  %s3573_s8 = int_to_ptr.hbm [resolvable:$true] %s3572_s8 }
  0x4d   : > { %s3574_s11 = scalar_lea.hbm %s3573_s8, 8  ;;  %p3580_p11 = scmp.lt.s32.totalorder %s3573_s8, %s4215_s16 }
  0x4e   : > { %p3575_p8 = scmp.ne.s32.totalorder %s3573_s8, %s3574_s11  ;;  %p3581_p0 = scmp.lt.s32.totalorder %s3579_s0, %s3574_s11 }
  0x50   : > { %p3577_p10 = pnand %p3576_p9, %p3575_p8  ;;  %p3582_p2 = por %p3581_p0, %p3580_p11 }
  0x52   : > { %p3578_p13 = pneg %p3577_p10 }
  0x54   : > { %p3583_p4 = pnand %p3582_p2, %p3578_p13 }
  0x56   : > { %3586 = shalt.err (!%p3583_p4)
}
  0x57   : > { %3215 = dma.hbm_to_vmem [thread:$0]  (!%p3956_p7), %s589_s21, 128, %s591_s6, %s579_s7  }
  0x58   : > { %s4217_s13 = sld [smem:[#allocation31_spill]]  ;;  %s600_s19 = scalar_lea.vmem [#allocation5], %s3939_s20 }
  0x59   : > { %s607_s17 = sshll.u32 %s600_s19, 4  ;;  %s598_s8 = scalar_lea.sflag [#allocation6], %s597_s4  ;;  %s608_s17 = int_to_ptr.vmem [resolvable:$true] %s607_s17 }
  0x5e   : > { %s603_s14 = scalar_lea.hbm %s4217_s13, %s3722_s27  ;;  %s3609_s6 = scalar_lea.hbm %s4217_s13, 2 }
  0x5f   : > { %s605_s26 = sshll.u32 %s603_s14, 4  ;;  %s606_s26 = int_to_ptr.hbm [resolvable:$true] %s605_s26 }
  0x60   : > { %s3602_s11 = sshra.s32 %s606_s26, 4  ;;  %s3603_s11 = int_to_ptr.hbm [resolvable:$true] %s3602_s11 }
  0x61   : > { %s3604_s0 = scalar_lea.hbm %s3603_s11, 1  ;;  %p3610_p13 = scmp.lt.s32.totalorder %s3603_s11, %s4217_s13 }
  0x62   : > { %p3605_p4 = scmp.ne.s32.totalorder %s3603_s11, %s3604_s0  ;;  %p3611_p11 = scmp.lt.s32.totalorder %s3609_s6, %s3604_s0 }
  0x64   : > { %p3607_p8 = pnand %p3605_p4, %p3576_p9  ;;  %p3612_p0 = por %p3611_p11, %p3610_p13 }
  0x66   : > { %p3608_p10 = pneg %p3607_p8 }
  0x68   : > { %p3613_p2 = pnand %p3612_p0, %p3608_p10 }
  0x6a   : > { %3616 = shalt.err (!%p3613_p2)
}
  0x6b   : > { %3218 = dma.hbm_to_vmem [thread:$0]  (!%p3956_p7), %s606_s26, 16, %s608_s17, %s598_s8  }
  0x6c   : > { %616 = sbr.rel (%p3861_p3) target bundleno = 2295 (0x8f7), region = 88  ;;  %s3994_s4 = sand.u32 (!%p3861_p3), 1, %s3714_s25  }
  0x6d   : > { %s2483_s14 = sshll.u32 (!%p3861_p3), %s3994_s4, 3  ;;  %s619_s20 = scalar_lea.sflag (!%p3861_p3), [#allocation3], %s3994_s4 }
  0x6e   : > { %s622_s22 = scalar_lea.vmem (!%p3861_p3), [#allocation2], %s2483_s14 }
  0x71   : > { %3677 = dma.done.wait (%p3932_p12), %s619_s20, 128  }
  0x72   : > { %3679 = vsyncadd (%p3932_p12), %s619_s20, 4294967168  ;;  %s628_s26 = sand.u32 1, %s3856_s30   ;;  %s631_s28 = scalar_lea.vmem [#allocation5], %s3994_s4 }
  0x73   : > { %s629_s18 = scalar_lea.sflag [#allocation6], %s628_s26 }
  0x74   : > { %3681 = dma.done.wait (%p3932_p12), %s629_s18, 16  }
  0x75   : > { %3683 = vsyncadd (%p3932_p12), %s629_s18, 4294967280 }
  0x76   : > { %3685 = dma.done.wait (%p61_p1), [#allocation6], 16  }
  0x77   : > { %3687 = vsyncadd (%p61_p1), [#allocation6], 4294967280 }
  0x78   : > { %3689 = dma.done.wait (%p61_p1), [#allocation9], 4112  }
  0x79   : > { %3691 = vsyncadd (%p61_p1), [#allocation9], 4294963184 }
  0x7a   : > { %3693 = dma.done.wait (%p61_p1), [#allocation12], 4096  }
  0x7b   : > { %3695 = vsyncadd (%p61_p1), [#allocation12], 4294963200 }
  0x7c   : > { %3697 = dma.done.wait (%p61_p1), [#allocation15], 4112  }
  0x7d   : > { %3699 = vsyncadd (%p61_p1), [#allocation15], 4294963184 }
  0x7e   : > { %3701 = dma.done.wait (%p61_p1), [#allocation18], 4096  }
  0x7f   : > { %3703 = vsyncadd (%p61_p1), [#allocation18], 4294963200  ;;  %v728_v0 = vld [vmem:[%s622_s22] sm:$0xff]  ;;  %v3738_v1 = vmov 128.0   ;;  %v2607_v2 = vld [vmem:[#allocation10 + $0xe0] sm:$0xf] }
  0x80   : > { %731 = vadd.xlane.f32.xlu0 %v728_v0  ;;  %3300 = vrcp.f32 %v3738_v1  ;;  %v3051_v3 = vld [vmem:[#allocation10 + $0xec] sm:$0xf0]  ;;  %v3049_v4 = vld [vmem:[#allocation10 + $0xe4] sm:$0xf]  ;;  %v2609_v6 = vld [vmem:[#allocation10 + $0xf0] sm:$0xf0] }
  0x81   : > { %v2608_v5 = vor.u32 %v3051_v3, %v2607_v2  ;;  %v2615_v7 = vld [vmem:[#allocation10 + $0xe8] sm:$0xf]  ;;  %v3052_v8 = vld [vmem:[#allocation10 + $0xf4] sm:$0xf0]  ;;  %v2612_v9 = vor.u32 %v3049_v4, %v2609_v6  ;;  %v3050_v11 = vld [vmem:[#allocation10 + $0xec] sm:$0xf] }
  0x82   : > { %v2616_v10 = vor.u32 %v3052_v8, %v2615_v7  ;;  %v2617_v12 = vld [vmem:[#allocation10 + $0xf8] sm:$0xf0]  ;;  %v2591_v24 = vld [vmem:[#allocation10 + $0xc0] sm:$0xf]  ;;  %v3047_v25 = vld [vmem:[#allocation10 + $0xcc] sm:$0xf0] }
  0x83   : > { %959 = vmatpush.bf16.msra.mxu0 %v2608_v5  ;;  %v2620_v13 = vor.u32 %v3050_v11, %v2617_v12  ;;  %972 = vmatpush.bf16.msra.mxu1 %v2612_v9  ;;  %v3045_v26 = vld [vmem:[#allocation10 + $0xc4] sm:$0xf]  ;;  %v2592_v27 = vor.u32 %v3047_v25, %v2591_v24  ;;  %v2593_v28 = vld [vmem:[#allocation10 + $0xd0] sm:$0xf0]  ;;  %v2599_v29 = vld [vmem:[#allocation10 + $0xc8] sm:$0xf] }
  0x84   : > { %985 = vmatpush.bf16.msra.mxu2 %v2616_v10  ;;  %v3048_v30 = vld [vmem:[#allocation10 + $0xd4] sm:$0xf0]  ;;  %v2596_v31 = vor.u32 %v3045_v26, %v2593_v28  ;;  %v3046_v33 = vld [vmem:[#allocation10 + $0xcc] sm:$0xf]  ;;  %v2601_v34 = vld [vmem:[#allocation10 + $0xd8] sm:$0xf0] }
  0x85   : > { %998 = vmatpush.bf16.msra.mxu3 %v2620_v13  ;;  %v2600_v32 = vor.u32 %v3048_v30, %v2599_v29  ;;  %v2604_v35 = vor.u32 %v3046_v33, %v2601_v34  ;;  %v2575_v36 = vld [vmem:[#allocation10 + $0xa0] sm:$0xf]  ;;  %v3043_v37 = vld [vmem:[#allocation10 + $0xac] sm:$0xf0]  ;;  %v3041_v38 = vld [vmem:[#allocation10 + $0xa4] sm:$0xf] }
  0x86   : > { %v3301_v14 = vpop.eup %3300  ;;  %v2576_v39 = vor.u32 %v3043_v37, %v2575_v36  ;;  %v2577_v40 = vld [vmem:[#allocation10 + $0xb0] sm:$0xf0]  ;;  %v2583_v41 = vld [vmem:[#allocation10 + $0xa8] sm:$0xf]  ;;  %v3044_v42 = vld [vmem:[#allocation10 + $0xb4] sm:$0xf0] }
  0x87   : > { %v734_v15 = vmul.f32 128.0, %v3301_v14  ;;  %vm738_vm0 = vweird.f32 %v3301_v14  ;;  %960 = vmatpush.bf16.msra.mxu0 %v2592_v27  ;;  %973 = vmatpush.bf16.msra.mxu1 %v2596_v31  ;;  %v2580_v43 = vor.u32 %v3041_v38, %v2577_v40  ;;  %v2584_v44 = vor.u32 %v3044_v42, %v2583_v41  ;;  %v3042_v45 = vld [vmem:[#allocation10 + $0xac] sm:$0xf]  ;;  %v2585_v46 = vld [vmem:[#allocation10 + $0xb8] sm:$0xf0]  ;;  %s3739_s19 = smov 64  }
  0x88   : > { %986 = vmatpush.bf16.msra.mxu2 %v2600_v32  ;;  %v2588_v47 = vor.u32 %v3042_v45, %v2585_v46  ;;  %v2559_v48 = vld [vmem:[#allocation10 + $0x80] sm:$0xf]  ;;  %v3039_v49 = vld [vmem:[#allocation10 + $0x8c] sm:$0xf0]  ;;  %v3037_v50 = vld [vmem:[#allocation10 + $0x84] sm:$0xf] }
  0x89   : > { %v735_v16 = vsub.f32 1.0, %v734_v15  ;;  %999 = vmatpush.bf16.msra.mxu3 %v2604_v35  ;;  %v2560_v51 = vor.u32 %v3039_v49, %v2559_v48  ;;  %v2561_v52 = vld [vmem:[#allocation10 + $0x90] sm:$0xf0]  ;;  %v2567_v53 = vld [vmem:[#allocation10 + $0x88] sm:$0xf]  ;;  %vm1275_vm4 = vcmask 261120  }
  0x8a   : > { %v3040_v54 = vld [vmem:[#allocation10 + $0x94] sm:$0xf0]  ;;  %v2564_v55 = vor.u32 %v3037_v50, %v2561_v52  ;;  %v3038_v57 = vld [vmem:[#allocation10 + $0x8c] sm:$0xf]  ;;  %v2569_v58 = vld [vmem:[#allocation10 + $0x98] sm:$0xf0] }
  0x8b   : > { %v736_v17 = vmul.f32 %v3301_v14, %v735_v16  ;;  %961 = vmatpush.bf16.msra.mxu0 %v2576_v39  ;;  %974 = vmatpush.bf16.msra.mxu1 %v2580_v43  ;;  %v2568_v56 = vor.u32 %v3040_v54, %v2567_v53  ;;  %v2572_v59 = vor.u32 %v3038_v57, %v2569_v58  ;;  %v2543_v60 = vld [vmem:[#allocation10 + $0x60] sm:$0xf]  ;;  %v3035_v61 = vld [vmem:[#allocation10 + $0x6c] sm:$0xf0]  ;;  %v3033_v62 = vld [vmem:[#allocation10 + $0x64] sm:$0xf] }
  0x8c   : > { %987 = vmatpush.bf16.msra.mxu2 %v2584_v44  ;;  %v2544_v63 = vor.u32 %v3035_v61, %v2543_v60  ;;  %v2551_v1 = vld [vmem:[#allocation10 + $0x68] sm:$0xf]  ;;  %v3036_v2 = vld [vmem:[#allocation10 + $0x74] sm:$0xf0]  ;;  %v3034_v5 = vld [vmem:[#allocation10 + $0x6c] sm:$0xf] }
  0x8d   : > { %v737_v18 = vadd.f32 %v3301_v14, %v736_v17  ;;  %1000 = vmatpush.bf16.msra.mxu3 %v2588_v47  ;;  %v2552_v4 = vor.u32 %v3036_v2, %v2551_v1  ;;  %v2553_v6 = vld [vmem:[#allocation10 + $0x78] sm:$0xf0]  ;;  %v2527_v8 = vld [vmem:[#allocation10 + $0x40] sm:$0xf]  ;;  %v3031_v9 = vld [vmem:[#allocation10 + $0x4c] sm:$0xf0] }
  0x8e   : > { %v2556_v7 = vor.u32 %v3034_v5, %v2553_v6  ;;  %v3029_v10 = vld [vmem:[#allocation10 + $0x44] sm:$0xf]  ;;  %v2528_v11 = vor.u32 %v3031_v9, %v2527_v8  ;;  %v2529_v12 = vld [vmem:[#allocation10 + $0x50] sm:$0xf0]  ;;  %v2535_v13 = vld [vmem:[#allocation10 + $0x48] sm:$0xf] }
  0x8f   : > { %v4028_v19 = vsel %vm738_vm0, %v3301_v14, %v737_v18  ;;  %962 = vmatpush.bf16.msra.mxu0 %v2560_v51  ;;  %975 = vmatpush.bf16.msra.mxu1 %v2564_v55  ;;  %v3032_v14 = vld [vmem:[#allocation10 + $0x54] sm:$0xf0]  ;;  %v2532_v15 = vor.u32 %v3029_v10, %v2529_v12  ;;  %v3030_v17 = vld [vmem:[#allocation10 + $0x4c] sm:$0xf]  ;;  %v2537_v18 = vld [vmem:[#allocation10 + $0x58] sm:$0xf0] }
  0x90   : > { %988 = vmatpush.bf16.msra.mxu2 %v2568_v56  ;;  %v2536_v16 = vor.u32 %v3032_v14, %v2535_v13  ;;  %v3025_v24 = vld [vmem:[#allocation10 + $0x24] sm:$0xf]  ;;  %v2513_v26 = vld [vmem:[#allocation10 + $0x30] sm:$0xf0]  ;;  %v2519_v27 = vld [vmem:[#allocation10 + $0x28] sm:$0xf] }
  0x91   : > { %1001 = vmatpush.bf16.msra.mxu3 %v2572_v59  ;;  %v3028_v28 = vld [vmem:[#allocation10 + $0x34] sm:$0xf0]  ;;  %v2516_v29 = vor.u32 %v3025_v24, %v2513_v26  ;;  %v3026_v31 = vld [vmem:[#allocation10 + $0x2c] sm:$0xf]  ;;  %v2521_v32 = vld [vmem:[#allocation10 + $0x38] sm:$0xf0] }
  0x92   : > { %v2520_v30 = vor.u32 %v3028_v28, %v2519_v27  ;;  %v2495_v33 = vld [vmem:[#allocation10] sm:$0xf]  ;;  %v2524_v34 = vor.u32 %v3026_v31, %v2521_v32  ;;  %v3023_v35 = vld [vmem:[#allocation10 + $0xc] sm:$0xf0]  ;;  %v3021_v36 = vld [vmem:[#allocation10 + $0x4] sm:$0xf] }
  0x93   : > { %963 = vmatpush.bf16.msra.mxu0 %v2544_v63  ;;  %v2497_v37 = vld [vmem:[#allocation10 + $0x10] sm:$0xf0]  ;;  %v2496_v38 = vor.u32 %v3023_v35, %v2495_v33  ;;  %v2503_v40 = vld [vmem:[#allocation10 + $0x8] sm:$0xf]  ;;  %v3024_v41 = vld [vmem:[#allocation10 + $0x14] sm:$0xf0] }
  0x94   : > { %989 = vmatpush.bf16.msra.mxu2 %v2552_v4  ;;  %v2500_v39 = vor.u32 %v3021_v36, %v2497_v37  ;;  %v3022_v42 = vld [vmem:[#allocation10 + $0xc] sm:$0xf]  ;;  %v2504_v43 = vor.u32 %v3024_v41, %v2503_v40  ;;  %v2505_v44 = vld [vmem:[#allocation10 + $0x18] sm:$0xf0]  ;;  %v2707_v47 = vld [vmem:[#allocation11 + $0xa8] sm:$0xf] }
  0x95   : > { %1002 = vmatpush.bf16.msra.mxu3 %v2556_v7  ;;  %v2508_v45 = vor.u32 %v3022_v42, %v2505_v44  ;;  %v3075_v48 = vld [vmem:[#allocation11 + $0xb0] sm:$0xf0]  ;;  %v3074_v49 = vld [vmem:[#allocation11 + $0xac] sm:$0xf]  ;;  %v2709_v52 = vld [vmem:[#allocation11 + $0xb4] sm:$0xf0] }
  0x96   : > { %v2708_v51 = vor.u32 %v3075_v48, %v2707_v47  ;;  %v2715_v53 = vld [vmem:[#allocation11 + $0xb0] sm:$0xf]  ;;  %v3076_v54 = vld [vmem:[#allocation11 + $0xb8] sm:$0xf0]  ;;  %v2712_v55 = vor.u32 %v3074_v49, %v2709_v52  ;;  %v3071_v59 = vld [vmem:[#allocation11 + $0x94] sm:$0xf] }
  0x97   : > { %964 = vmatpush.bf16.msra.mxu0 %v2528_v11  ;;  %v2716_v56 = vor.u32 %v3076_v54, %v2715_v53  ;;  %v2695_v57 = vld [vmem:[#allocation11 + $0x90] sm:$0xf]  ;;  %v3072_v58 = vld [vmem:[#allocation11 + $0x98] sm:$0xf0]  ;;  %v2703_v63 = vld [vmem:[#allocation11 + $0x98] sm:$0xf] }
  0x98   : > { %990 = vmatpush.bf16.msra.mxu2 %v2536_v16  ;;  %v2696_v61 = vor.u32 %v3072_v58, %v2695_v57  ;;  %v3073_v1 = vld [vmem:[#allocation11 + $0xa0] sm:$0xf0]  ;;  %v2683_v2 = vld [vmem:[#allocation11 + $0x78] sm:$0xf]  ;;  %v3068_v5 = vld [vmem:[#allocation11 + $0x7c] sm:$0xf] }
  0x99   : > { %v2704_v4 = vor.u32 %v3073_v1, %v2703_v63  ;;  %v2685_v6 = vld [vmem:[#allocation11 + $0x84] sm:$0xf0]  ;;  %v2691_v7 = vld [vmem:[#allocation11 + $0x80] sm:$0xf]  ;;  %v3070_v8 = vld [vmem:[#allocation11 + $0x88] sm:$0xf0] }
  0x9a   : > { %v2688_v10 = vor.u32 %v3068_v5, %v2685_v6  ;;  %v2692_v11 = vor.u32 %v3070_v8, %v2691_v7  ;;  %v2671_v12 = vld [vmem:[#allocation11 + $0x60] sm:$0xf]  ;;  %v3066_v13 = vld [vmem:[#allocation11 + $0x68] sm:$0xf0]  ;;  %v3065_v14 = vld [vmem:[#allocation11 + $0x64] sm:$0xf] }
  0x9b   : > { %v2679_v16 = vld [vmem:[#allocation11 + $0x68] sm:$0xf]  ;;  %v3063_v26 = vld [vmem:[#allocation11 + $0x50] sm:$0xf0]  ;;  %v3062_v27 = vld [vmem:[#allocation11 + $0x4c] sm:$0xf] }
  0x9c   : > { %991 = vmatpush.bf16.msra.mxu2 %v2520_v30  ;;  %v2661_v28 = vld [vmem:[#allocation11 + $0x54] sm:$0xf0]  ;;  %v3064_v30 = vld [vmem:[#allocation11 + $0x58] sm:$0xf0]  ;;  %v2647_v33 = vld [vmem:[#allocation11 + $0x30] sm:$0xf] }
  0x9d   : > { %v2664_v35 = vor.u32 %v3062_v27, %v2661_v28  ;;  %v3060_v37 = vld [vmem:[#allocation11 + $0x38] sm:$0xf0]  ;;  %v2655_v40 = vld [vmem:[#allocation11 + $0x38] sm:$0xf]  ;;  %v3061_v41 = vld [vmem:[#allocation11 + $0x40] sm:$0xf0] }
  0x9e   : > { %v3291_v47 = vld [vmem:[#allocation7] ss:$0 sm:$0xff]  ;;  %v2635_v54 = vld [vmem:[#allocation11 + $0x18] sm:$0xf]  ;;  %v2637_v58 = vld [vmem:[#allocation11 + $0x24] sm:$0xf0] }
  0x9f   : > { %v3056_v57 = vld [vmem:[#allocation11 + $0x1c] sm:$0xf]  ;;  %v3054_v63 = vld [vmem:[#allocation11 + $0x8] sm:$0xf0]  ;;  %s3740_s17 = smov 96   ;;  %vm1404_vm5 = vcmask 1043456  }
  0xa0   : > { %992 = vmatpush.bf16.msra.mxu2 %v2504_v43  ;;  %v2648_v43 = vor.u32 %v3060_v37, %v2647_v33  ;;  %s3741_s8 = smov 32   ;;  %vm1352_vm6 = vcmask 64512   ;;  %s4218_s3 = sld [smem:[#allocation39_spill]] }
  0xa1   : > { %s4219_s22 = sld [smem:[#allocation41_spill]]  ;;  %s2492_s26 = sshll.u32 %s3994_s4, 2 }
  0xa2   : > { %s3018_s18 = sshll.u32 %s3856_s30, 2  ;;  %s4220_s29 = sld [smem:[#allocation42_spill]] }
  0xa3   : > { %s4222_s1 = sld [smem:[#allocation44_spill]]  ;;  %s726_s6 = scalar_lea.vmem [#allocation19], %s2492_s26 }
  0xa4   : > { %1209 = vmatpush.bf16.msrb.mxu2 %v2716_v56  ;;  %s2301_s30 = sshll.u32 %s726_s6, 4  ;;  %s2302_s30 = int_to_ptr.vmem [resolvable:$true] %s2301_s30 }
  0xa8   : > { %1210 = vmatpush.bf16.msrb.mxu2 %v2704_v4  ;;  %v3055_v4 = vld [vmem:[#allocation11 + $0x10] sm:$0xf0] }
  0xa9   : > { %s2299_s7 = scalar_lea.hbm %s4222_s1, %s3018_s18  ;;  %s3652_s18 = scalar_lea.hbm %s4222_s1, 8 }
  0xaa   : > { %s2303_s21 = sshll.u32 %s2299_s7, 4  ;;  %s2304_s21 = int_to_ptr.hbm [resolvable:$true] %s2303_s21 }
  0xab   : > { %s3646_s14 = sshra.s32 %s2304_s21, 4  ;;  %s3647_s14 = int_to_ptr.hbm [resolvable:$true] %s3646_s14 }
  0xac   : > { %1211 = vmatpush.bf16.msrb.mxu2 %v2692_v11  ;;  %s3648_s20 = scalar_lea.hbm %s3647_s14, 4  ;;  %p3653_p7 = scmp.lt.s32.totalorder %s3647_s14, %s4222_s1 }
  0xad   : > { %p3649_p1 = scmp.ne.s32.totalorder %s3647_s14, %s3648_s20  ;;  %p3654_p9 = scmp.lt.s32.totalorder %s3652_s18, %s3648_s20 }
  0xaf   : > { %p3650_p3 = pnand %p3649_p1, %p3941_p5  ;;  %p3655_p4 = por %p3654_p9, %p3653_p7 }
  0xb1   : > { %p3651_p12 = pneg %p3650_p3 }
  0xb3   : > { %p3656_p8 = pnand %p3655_p4, %p3651_p12 }
  0xf3   : > { %v732_v20 = vpop.xlane.xlu0 %731 }
  0xf4   : > { %v740_v21 = vmul.f32 %v4028_v19, %v732_v20  ;;  %v2540_v20 = vor.u32 %v3030_v17, %v2537_v18  ;;  %v3067_v17 = vld [vmem:[#allocation11 + $0x70] sm:$0xf0] }
  0xf5   : > { %v2680_v24 = vor.u32 %v3067_v17, %v2679_v16  ;;  %v1011_v16 = vld [vmem:[%s4167_s5] sm:$0x7] }
  0xf6   : > { %v4031_v22 = vsub.f32 %v728_v0, %v740_v21  ;;  %v2545_v0 = vld [vmem:[#allocation10 + $0x70] sm:$0xf0]  ;;  %v2511_v21 = vld [vmem:[#allocation10 + $0x20] sm:$0xf]  ;;  %1003 = vmatpush.bf16.msra.mxu3 %v2540_v20  ;;  %v2672_v20 = vor.u32 %v3066_v13, %v2671_v12  ;;  %v1013_v17 = vperm.slane %v1011_v16, 0 }
  0xf7   : > { %v2548_v3 = vor.u32 %v3033_v62, %v2545_v0  ;;  %v2697_v62 = vld [vmem:[#allocation11 + $0x9c] sm:$0xf0]  ;;  %1212 = vmatpush.bf16.msrb.mxu2 %v2680_v24 }
  0xf8   : > { %v742_v23 = vmul.f32 %v4031_v22, %v4031_v22  ;;  %v2700_v0 = vor.u32 %v3071_v59, %v2697_v62  ;;  %v2640_v59 = vor.u32 %v3056_v57, %v2637_v58  ;;  %v2623_v62 = vld [vmem:[#allocation11] sm:$0xf] }
  0xf9   : > { %976 = vmatpush.bf16.msra.mxu1 %v2548_v3  ;;  %v3069_v3 = vld [vmem:[#allocation11 + $0x80] sm:$0xf0]  ;;  %v2624_v1 = vor.u32 %v3054_v63, %v2623_v62 }
  0xfa   : > { %743 = vadd.xlane.f32.xlu0 %v742_v23  ;;  %v3027_v23 = vld [vmem:[#allocation10 + $0x2c] sm:$0xf0]  ;;  %1004 = vmatpush.bf16.msra.mxu3 %v2524_v34  ;;  %v2684_v9 = vor.u32 %v3069_v3, %v2683_v2  ;;  %v2631_v3 = vld [vmem:[#allocation11 + $0x8] sm:$0xf] }
  0xfb   : > { %v2512_v25 = vor.u32 %v3027_v23, %v2511_v21  ;;  %v2625_v2 = vld [vmem:[#allocation11 + $0xc] sm:$0xf0]  ;;  %v2632_v6 = vor.u32 %v3055_v4, %v2631_v3 }
  0xfd   : > { %977 = vmatpush.bf16.msra.mxu1 %v2532_v15  ;;  %965 = vmatpush.bf16.msra.mxu0 %v2512_v25  ;;  %v2673_v15 = vld [vmem:[#allocation11 + $0x6c] sm:$0xf0]  ;;  %v2659_v25 = vld [vmem:[#allocation11 + $0x48] sm:$0xf] }
  0xfe   : > { %1005 = vmatpush.bf16.msra.mxu3 %v2508_v45  ;;  %v2676_v23 = vor.u32 %v3065_v14, %v2673_v15  ;;  %v2660_v32 = vor.u32 %v3063_v26, %v2659_v25 }
 0x101   : > { %978 = vmatpush.bf16.msra.mxu1 %v2516_v29  ;;  %966 = vmatpush.bf16.msra.mxu0 %v2496_v38  ;;  %v2667_v29 = vld [vmem:[#allocation11 + $0x50] sm:$0xf]  ;;  %v3059_v38 = vld [vmem:[#allocation11 + $0x34] sm:$0xf] }
 0x102   : > { %v2668_v36 = vor.u32 %v3064_v30, %v2667_v29  ;;  %v1015_v29 = vperm.slane %v1011_v16, 2 }
 0x104   : > { %1213 = vmatpush.bf16.msrb.mxu2 %v2668_v36 }
 0x105   : > { %979 = vmatpush.bf16.msra.mxu1 %v2500_v39  ;;  %1183 = vmatpush.bf16.msrb.mxu0 %v2708_v51  ;;  %v2649_v39 = vld [vmem:[#allocation11 + $0x3c] sm:$0xf0] }
 0x106   : > { %v2652_v45 = vor.u32 %v3059_v38, %v2649_v39 }
 0x109   : > { %1196 = vmatpush.bf16.msrb.mxu1 %v2712_v55  ;;  %1184 = vmatpush.bf16.msrb.mxu0 %v2696_v61  ;;  %v3057_v55 = vld [vmem:[#allocation11 + $0x20] sm:$0xf0] }
 0x10a   : > { %v2636_v56 = vor.u32 %v3057_v55, %v2635_v54 }
 0x10d   : > { %1197 = vmatpush.bf16.msrb.mxu1 %v2700_v0  ;;  %1185 = vmatpush.bf16.msrb.mxu0 %v2684_v9  ;;  %v3053_v0 = vld [vmem:[#allocation11 + $0x4] sm:$0xf] }
 0x10e   : > { %v2628_v5 = vor.u32 %v3053_v0, %v2625_v2 }
 0x111   : > { %1198 = vmatpush.bf16.msrb.mxu1 %v2688_v10  ;;  %1186 = vmatpush.bf16.msrb.mxu0 %v2672_v20 }
 0x115   : > { %1199 = vmatpush.bf16.msrb.mxu1 %v2676_v23  ;;  %1187 = vmatpush.bf16.msrb.mxu0 %v2660_v32 }
 0x119   : > { %1200 = vmatpush.bf16.msrb.mxu1 %v2664_v35  ;;  %1188 = vmatpush.bf16.msrb.mxu0 %v2648_v43 }
 0x11d   : > { %1201 = vmatpush.bf16.msrb.mxu1 %v2652_v45  ;;  %1189 = vmatpush.bf16.msrb.mxu0 %v2636_v56 }
 0x121   : > { %1202 = vmatpush.bf16.msrb.mxu1 %v2640_v59  ;;  %1190 = vmatpush.bf16.msrb.mxu0 %v2624_v1 }
 0x125   : > { %1203 = vmatpush.bf16.msrb.mxu1 %v2628_v5 }
 0x16d   : > { %v744_v46 = vpop.xlane.xlu0 %743 }
 0x16e   : > { %v745_v50 = vmul.f32 %v744_v46, %v4028_v19  ;;  %v2656_v46 = vor.u32 %v3061_v41, %v2655_v40 }
 0x170   : > { %v4036_v60 = vadd.f32 1e-12, %v745_v50  ;;  %v3292_v50 = vld [vmem:[#allocation8] ss:$0 sm:$0xff]  ;;  %1214 = vmatpush.bf16.msrb.mxu2 %v2656_v46 }
 0x172   : > { %3302 = vrsqrt.f32 %v4036_v60  ;;  %vm753_vm2 = vweird.f32 %v4036_v60 }
 0x178   : > { %v3303_v18 = vpop.eup %3302 }
 0x179   : > { %v748_v21 = vmul.f32 %v3303_v18, %v4036_v60  ;;  %vm754_vm1 = vweird.f32 %v3303_v18  ;;  %v3058_v60 = vld [vmem:[#allocation11 + $0x28] sm:$0xf0] }
 0x17a   : > { %vm755_vm3 = vmor %vm753_vm2, %vm754_vm1 }
 0x17b   : > { %v749_v31 = vmul.f32 %v3303_v18, %v748_v21 }
 0x17d   : > { %v750_v34 = vmul.f32 0.5, %v749_v31 }
 0x17f   : > { %v751_v42 = vsub.f32 1.5, %v750_v34 }
 0x181   : > { %v752_v44 = vmul.f32 %v3303_v18, %v751_v42 }
 0x183   : > { %v756_v48 = vsel %vm755_vm3, %v3303_v18, %v752_v44  ;;  %v1014_v18 = vperm.slane %v1011_v16, 1 }
 0x184   : > { %v757_v49 = vmul.f32 %v756_v48, %v4031_v22  ;;  %v2643_v22 = vld [vmem:[#allocation11 + $0x20] sm:$0xf] }
 0x185   : > { %v2644_v61 = vor.u32 %v3058_v60, %v2643_v22  ;;  %v3293_v22 = vld [vmem:[%s631_s28] ss:$0 sm:$0xff] }
 0x186   : > { %v761_v51 = vmul.f32 %v3291_v47, %v757_v49 }
 0x187   : > { %1215 = vmatpush.bf16.msrb.mxu2 %v2644_v61 }
 0x188   : > { %v4042_v52 = vadd.f32 %v3292_v50, %v761_v51 }
 0x18a   : > { %v766_v53 = vpack.c.bf16 %v4042_v52, %v4042_v52 }
 0x18b   : > { %1216 = vmatpush.bf16.msrb.mxu2 %v2632_v6 }
 0x18c   : > { %967 = vmatmul.bf16.vlgmr.msra.gmra.mxu0 %v766_v53  ;;  %980 = vmatmul.bf16.vlgmr.msra.gmra.mxu1 %v766_v53 }
 0x18d   : > { %993 = vmatmul.bf16.vlgmr.msra.gmra.mxu2 %v766_v53  ;;  %1006 = vmatmul.bf16.vlgmr.msra.gmra.mxu3 %v766_v53 }
 0x209   : > { %v968_v7 = vpop.f32.mrf.mxu0  ;;  %v981_v8 = vpop.f32.mrf.mxu1 }
 0x20a   : > { %v1019_v23 = vadd.f32 %v1013_v17, %v968_v7  ;;  %v1020_v24 = vadd.f32 %v1014_v18, %v981_v8 }
 0x210   : > { %v994_v9 = vpop.f32.mrf.mxu2  ;;  %v1007_v10 = vpop.f32.mrf.mxu3 }
 0x211   : > { %v1022_v11 = vpack.c.bf16 %v1007_v10, %v1007_v10  ;;  %v970_v12 = vpop.f32.mrf.mxu0  ;;  %v983_v13 = vpop.f32.mrf.mxu1  ;;  %v1021_v34 = vadd.f32 %v1015_v29, %v994_v9 }
 0x213   : > { %1191 = vmatmul.bf16.vlgmr.msrb.gmra.mxu0 %v1022_v11  ;;  %1204 = vmatmul.bf16.vlgmr.msrb.gmra.mxu1 %v1022_v11 }
 0x214   : > { %1217 = vmatmul.bf16.vlgmr.msrb.gmra.mxu2 %v1022_v11 }
 0x218   : > { %v996_v14 = vpop.f32.mrf.mxu2  ;;  %v1009_v15 = vpop.f32.mrf.mxu3 }
 0x290   : > { %v1192_v20 = vpop.f32.mrf.mxu0  ;;  %v1205_v21 = vpop.f32.mrf.mxu1 }
 0x291   : > { %v1222_v25 = vmul.f32 2.828427, %v1192_v20  ;;  %v1223_v26 = vmul.f32 2.828427, %v1205_v21 }
 0x293   : > { %v1225_v27 = vadd.f32 %v1222_v25, %v1019_v23  ;;  %v1226_v28 = vadd.f32 %v1223_v26, %v1020_v24 }
 0x295   : > { %v1228_v30 = vmul.f32 0.17677669, %v1225_v27  ;;  %1247 = vrot.lane.b32.xlu2 %v1226_v28, %s3739_s19  ;;  %1244 = vrot.lane.b32.xlu1 %v1226_v28, %s3740_s17  ;;  %v1253_v31 = vpack.c.bf16 %v1226_v28, %v1226_v28 }
 0x297   : > { %v1218_v32 = vpop.f32.mrf.mxu2  ;;  %1233 = vrot.lane.b32.xlu0 %v1228_v30, %s3739_s19  ;;  %v1280_v33 = vsel %vm1275_vm4, %v1253_v31, 0  ;;  %v1239_v40 = vpack.c.bf16 %v1228_v30, %v1228_v30 }
 0x298   : > { %v1224_v35 = vmul.f32 2.828427, %v1218_v32  ;;  %v1194_v36 = vpop.f32.mrf.mxu0  ;;  %v1207_v37 = vpop.f32.mrf.mxu1  ;;  %1289 = vmatpush.bf16.xpose.msrb.mxu3 %v1280_v33 }
 0x29a   : > { %v4053_v38 = vadd.f32 %v1224_v35, %v1021_v34 }
 0x29c   : > { %v1267_v39 = vpack.c.bf16 %v4053_v38, %v4053_v38 }
 0x29d   : > { %1250 = vrot.lane.b32.xlu2 %v1226_v28, %s3741_s8  ;;  %1230 = vrot.lane.b32.xlu1 %v1228_v30, %s3740_s17 }
 0x29e   : > { %v1406_v41 = vsel %vm1404_vm5, %v1267_v39, 0 }
 0x29f   : > { %v1220_v42 = vpop.f32.mrf.mxu2  ;;  %1415 = vmatpush.bf16.msra.mxu2 %v1406_v41  ;;  %2717 = vmatmul.msk.bf16.vlgmr.msrb.gmra.mxu3 %vm1275_vm4, %v1239_v40  ;;  %v3078_v41 = vld [vmem:[#allocation13 + $0x8] sm:$0xff] }
 0x2a5   : > { %1236 = vrot.lane.b32.xlu1 %v1228_v30, %s3741_s8 }
 0x2ef   : > { %v1248_v43 = vpop.permute.xlu2 %1247 }
 0x2f0   : > { %v1255_v44 = vpack.c.bf16 %v1248_v43, %v1248_v43  ;;  %v3077_v43 = vld [vmem:[#allocation13] sm:$0xff] }
 0x2f2   : > { %v1318_v45 = vsel %vm1275_vm4, %v1255_v44, 0 }
 0x2f3   : > { %1327 = vmatpush.bf16.xpose.msra.mxu0 %v1318_v45  ;;  %v3080_v45 = vld [vmem:[#allocation13 + $0x18] sm:$0xff] }
 0x2f4   : > { %1509 = vmatpush.bf16.msrb.mxu2 %v3080_v45 }
 0x2f7   : > { %v1251_v46 = vpop.permute.xlu2 %1250 }
 0x2f8   : > { %v1256_v47 = vpack.c.bf16 %v1251_v46, %v1251_v46 }
 0x2fa   : > { %v1337_v48 = vsel %vm1275_vm4, %v1256_v47, 0 }
 0x2fb   : > { %1346 = vmatpush.bf16.xpose.msra.mxu1 %v1337_v48 }
 0x307   : > { %v1245_v49 = vpop.permute.xlu1 %1244 }
 0x308   : > { %v1254_v50 = vpack.c.bf16 %v1245_v49, %v1245_v49 }
 0x309   : > { %v1234_v51 = vpop.permute.xlu0 %1233 }
 0x30a   : > { %v1299_v53 = vsel %vm1275_vm4, %v1254_v50, 0  ;;  %v1241_v54 = vpack.c.bf16 %v1234_v51, %v1234_v51 }
 0x30b   : > { %1308 = vmatpush.bf16.xpose.msra.mxu3 %v1299_v53 }
 0x30c   : > { %2719 = vmatmul.msk.bf16.vlgmr.msra.gmra.mxu0 %vm1275_vm4, %v1241_v54 }
 0x30f   : > { %v1231_v55 = vpop.permute.xlu1 %1230 }
 0x310   : > { %v1240_v56 = vpack.c.bf16 %v1231_v55, %v1231_v55 }
 0x312   : > { %2718 = vmatmul.msk.bf16.vlgmr.msra.gmra.mxu3 %vm1275_vm4, %v1240_v56 }
 0x317   : > { %v1237_v57 = vpop.permute.xlu1 %1236 }
 0x318   : > { %v1242_v58 = vpack.c.bf16 %v1237_v57, %v1237_v57 }
 0x31a   : > { %2720 = vmatmul.msk.bf16.vlgmr.msra.gmra.mxu1 %vm1275_vm4, %v1242_v58 }
 0x322   : > { %v1291_v59 = vpop.f32.mrf.mxu3 }
 0x323   : > { %v1292_v60 = vadd.f32 %v3293_v22, %v1291_v59 }
 0x325   : > { %v1353_v61 = vsel %vm1352_vm6, %v1292_v60, -inf }
 0x326   : > { %1354 = vmax.xlane.f32.xlu2 %v1353_v61 }
 0x32a   : > { %v1293_v62 = vpop.f32.mrf.mxu3 }
 0x389   : > { %v1329_v63 = vpop.f32.mrf.mxu0 }
 0x38a   : > { %v1330_v0 = vadd.f32 %v3293_v22, %v1329_v63 }
 0x38c   : > { %v1359_v1 = vsel %vm1352_vm6, %v1330_v0, -inf }
 0x38d   : > { %1360 = vmax.xlane.f32.xlu0 %v1359_v1  ;;  %v3084_v1 = vld [vmem:[#allocation13 + $0x38] sm:$0xff] }
 0x391   : > { %v1331_v2 = vpop.f32.mrf.mxu0 }
 0x392   : > { %v3082_v2 = vld [vmem:[#allocation13 + $0x28] sm:$0xff] }
 0x395   : > { %v1310_v3 = vpop.f32.mrf.mxu3 }
 0x396   : > { %v1311_v4 = vadd.f32 %v3293_v22, %v1310_v3  ;;  %v3083_v3 = vld [vmem:[#allocation13 + $0x30] sm:$0xff] }
 0x397   : > { %v1348_v5 = vpop.f32.mrf.mxu1 }
 0x398   : > { %v1349_v6 = vadd.f32 %v3293_v22, %v1348_v5  ;;  %v1356_v7 = vsel %vm1352_vm6, %v1311_v4, -inf }
 0x399   : > { %1357 = vmax.xlane.f32.xlu1 %v1356_v7  ;;  %v1355_v8 = vpop.xlane.xlu2 %1354 }
 0x39a   : > { %v1365_v9 = vsub.f32 %v1292_v60, %v1355_v8  ;;  %v1362_v10 = vsel %vm1352_vm6, %v1349_v6, -inf }
 0x39b   : > { %1363 = vmax.xlane.f32.xlu2 %v1362_v10 }
 0x39c   : > { %v1369_v11 = vmul.f32 1.442695, %v1365_v9 }
 0x39d   : > { %v1312_v12 = vpop.f32.mrf.mxu3 }
 0x39e   : > { %3304 = vpow2.f32 %v1369_v11 }
 0x39f   : > { %v1350_v13 = vpop.f32.mrf.mxu1 }
 0x3a4   : > { %v3305_v14 = vpop.eup %3304 }
 0x3a5   : > { %v1377_v15 = vsel %vm1352_vm6, %v3305_v14, 0.0 }
 0x3a6   : > { %1378 = vadd.xlane.f32.xlu2 %v1377_v15 }
 0x3be   : > { %1258 = vrot.lane.b32.xlu2 %v4053_v38, %s3740_s17 }
 0x400   : > { %v1361_v16 = vpop.xlane.xlu0 %1360 }
 0x401   : > { %v1367_v17 = vsub.f32 %v1330_v0, %v1361_v16  ;;  %v3079_v0 = vld [vmem:[#allocation13 + $0x10] sm:$0xff] }
 0x402   : > { %1510 = vmatpush.bf16.msrb.mxu2 %v3079_v0 }
 0x403   : > { %v1373_v18 = vmul.f32 1.442695, %v1367_v17 }
 0x405   : > { %3306 = vpow2.f32 %v1373_v18 }
 0x40b   : > { %v3307_v20 = vpop.eup %3306 }
 0x40c   : > { %v1358_v21 = vpop.xlane.xlu1 %1357  ;;  %v1383_v23 = vsel %vm1352_vm6, %v3307_v20, 0.0 }
 0x40d   : > { %v1366_v24 = vsub.f32 %v1311_v4, %v1358_v21  ;;  %1384 = vadd.xlane.f32.xlu1 %v1383_v23  ;;  %v3081_v4 = vld [vmem:[#allocation13 + $0x20] sm:$0xff] }
 0x40e   : > { %v1364_v25 = vpop.xlane.xlu2 %1363 }
 0x40f   : > { %v1371_v26 = vmul.f32 1.442695, %v1366_v24  ;;  %v1368_v27 = vsub.f32 %v1349_v6, %v1364_v25  ;;  %v3294_v24 = vld [vmem:[#allocation14] ss:$0 sm:$0xff] }
 0x411   : > { %3308 = vpow2.f32 %v1371_v26  ;;  %v1375_v28 = vmul.f32 1.442695, %v1368_v27 }
 0x413   : > { %3310 = vpow2.f32 %v1375_v28 }
 0x417   : > { %v3309_v29 = vpop.eup %3308 }
 0x418   : > { %v1380_v30 = vsel %vm1352_vm6, %v3309_v29, 0.0 }
 0x419   : > { %v3311_v31 = vpop.eup %3310  ;;  %v1379_v32 = vpop.xlane.xlu2 %1378  ;;  %1381 = vadd.xlane.f32.xlu1 %v1380_v30  ;;  %v2875_v30 = vld [vmem:[#allocation16 + $0xe0] sm:$0xf] }
 0x41a   : > { %3312 = vrcp.f32 %v1379_v32  ;;  %v1386_v33 = vsel %vm1352_vm6, %v3311_v31, 0.0  ;;  %v3113_v32 = vld [vmem:[#allocation16 + $0xe4] sm:$0xf] }
 0x41b   : > { %1387 = vadd.xlane.f32.xlu0 %v1386_v33 }
 0x420   : > { %v3313_v34 = vpop.eup %3312 }
 0x421   : > { %v1393_v35 = vmul.f32 %v3313_v34, %v3305_v14  ;;  %v1259_v36 = vpop.permute.xlu2 %1258  ;;  %v2877_v34 = vld [vmem:[#allocation16 + $0xf0] sm:$0xf0] }
 0x422   : > { %v1268_v37 = vpack.c.bf16 %v1259_v36, %v1259_v36  ;;  %v3116_v36 = vld [vmem:[#allocation16 + $0xf4] sm:$0xf0] }
 0x423   : > { %v1397_v39 = vpack.c.bf16 %v1393_v35, %v1393_v35  ;;  %v2883_v35 = vld [vmem:[#allocation16 + $0xe8] sm:$0xf] }
 0x424   : > { %v1425_v40 = vsel %vm1404_vm5, %v1268_v37, 0  ;;  %v2880_v37 = vor.u32 %v3113_v32, %v2877_v34  ;;  %v3095_v32 = vld [vmem:[#allocation16 + $0x4c] sm:$0xf0] }
 0x425   : > { %2721 = vmatmul.msk.bf16.vlgmr.msra.gmra.mxu2 %vm1352_vm6, %v1397_v39  ;;  %1434 = vmatpush.bf16.msrb.mxu3 %v1425_v40  ;;  %v2884_v39 = vor.u32 %v3116_v36, %v2883_v35  ;;  %v3114_v40 = vld [vmem:[#allocation16 + $0xec] sm:$0xf]  ;;  %v2797_v35 = vld [vmem:[#allocation16 + $0x50] sm:$0xf0]  ;;  %v2803_v36 = vld [vmem:[#allocation16 + $0x48] sm:$0xf] }
 0x429   : > { %1537 = vmatpush.bf16.msra.mxu3 %v3078_v41  ;;  %v2885_v41 = vld [vmem:[#allocation16 + $0xf8] sm:$0xf0] }
 0x42d   : > { %1538 = vmatpush.bf16.msra.mxu3 %v3077_v43 }
 0x42f   : > { %1264 = vrot.lane.b32.xlu0 %v4053_v38, %s3741_s8  ;;  %s4221_s8 = sld [smem:[#allocation43_spill]] }
 0x432   : > { %1261 = vrot.lane.b32.xlu1 %v4053_v38, %s3739_s19 }
 0x480   : > { %v1385_v42 = vpop.xlane.xlu1 %1384 }
 0x48c   : > { %v1382_v44 = vpop.xlane.xlu1 %1381 }
 0x48d   : > { %3314 = vrcp.f32 %v1382_v44 }
 0x48e   : > { %v1388_v49 = vpop.xlane.xlu0 %1387 }
 0x48f   : > { %3316 = vrcp.f32 %v1388_v49 }
 0x490   : > { %3318 = vrcp.f32 %v1385_v42  ;;  %v2888_v42 = vor.u32 %v3114_v40, %v2885_v41  ;;  %v3094_v41 = vld [vmem:[#allocation16 + $0x4c] sm:$0xf] }
 0x493   : > { %v3315_v46 = vpop.eup %3314 }
 0x494   : > { %v1394_v47 = vmul.f32 %v3315_v46, %v3309_v29  ;;  %v2859_v46 = vld [vmem:[#allocation16 + $0xc0] sm:$0xf] }
 0x495   : > { %v3317_v50 = vpop.eup %3316 }
 0x496   : > { %v1398_v48 = vpack.c.bf16 %v1394_v47, %v1394_v47  ;;  %v3319_v38 = vpop.eup %3318  ;;  %v1396_v53 = vmul.f32 %v3317_v50, %v3311_v31  ;;  %v3115_v31 = vld [vmem:[#allocation16 + $0xec] sm:$0xf0]  ;;  %v2861_v50 = vld [vmem:[#allocation16 + $0xd0] sm:$0xf0] }
 0x497   : > { %v1395_v57 = vmul.f32 %v3319_v38, %v3307_v20  ;;  %v2876_v33 = vor.u32 %v3115_v31, %v2875_v30  ;;  %v3111_v47 = vld [vmem:[#allocation16 + $0xcc] sm:$0xf0]  ;;  %v3112_v38 = vld [vmem:[#allocation16 + $0xd4] sm:$0xf0]  ;;  %v2795_v31 = vld [vmem:[#allocation16 + $0x40] sm:$0xf] }
 0x498   : > { %2722 = vmatmul.msk.bf16.vlgmr.msrb.gmra.mxu3 %vm1352_vm6, %v1398_v48  ;;  %v1400_v22 = vpack.c.bf16 %v1396_v53, %v1396_v53  ;;  %v3109_v48 = vld [vmem:[#allocation16 + $0xc4] sm:$0xf]  ;;  %v2860_v49 = vor.u32 %v3111_v47, %v2859_v46  ;;  %v2796_v34 = vor.u32 %v3095_v32, %v2795_v31  ;;  %v3122_v32 = vld [vmem:[#allocation17 + $0x28] sm:$0xff] }
 0x499   : > { %v1399_v61 = vpack.c.bf16 %v1395_v57, %v1395_v57  ;;  %1851 = vmatpush.bf16.msra.mxu2 %v2876_v33  ;;  %1864 = vmatpush.bf16.msrb.mxu3 %v2880_v37  ;;  %v2864_v53 = vor.u32 %v3109_v48, %v2861_v50  ;;  %v3093_v33 = vld [vmem:[#allocation16 + $0x44] sm:$0xf]  ;;  %v3096_v37 = vld [vmem:[#allocation16 + $0x54] sm:$0xf0]  ;;  %v2781_v48 = vld [vmem:[#allocation16 + $0x30] sm:$0xf0] }
 0x49a   : > { %v2804_v40 = vor.u32 %v3096_v37, %v2803_v36  ;;  %v3089_v46 = vld [vmem:[#allocation16 + $0x24] sm:$0xf]  ;;  %v3092_v50 = vld [vmem:[#allocation16 + $0x34] sm:$0xf0] }
 0x49b   : > { %v3145_v31 = vld [vmem:[#allocation17 + $0xe0] sm:$0xff] }
 0x49c   : > { %v3121_v36 = vld [vmem:[#allocation17 + $0x20] sm:$0xff] }
 0x49d   : > { %1852 = vmatpush.bf16.msra.mxu2 %v2860_v49  ;;  %1865 = vmatpush.bf16.msrb.mxu3 %v2864_v53  ;;  %v2787_v49 = vld [vmem:[#allocation16 + $0x28] sm:$0xf]  ;;  %v3090_v53 = vld [vmem:[#allocation16 + $0x2c] sm:$0xf]  ;;  %v3129_v37 = vld [vmem:[#allocation17 + $0x60] sm:$0xff] }
 0x4a1   : > { %v1265_v51 = vpop.permute.xlu0 %1264 }
 0x4a2   : > { %v1270_v54 = vpack.c.bf16 %v1265_v51, %v1265_v51  ;;  %v2867_v51 = vld [vmem:[#allocation16 + $0xc8] sm:$0xf] }
 0x4a4   : > { %v1463_v55 = vsel %vm1404_vm5, %v1270_v54, 0  ;;  %v1262_v56 = vpop.permute.xlu1 %1261  ;;  %v2868_v54 = vor.u32 %v3112_v38, %v2867_v51  ;;  %v2784_v51 = vor.u32 %v3089_v46, %v2781_v48  ;;  %v2788_v38 = vor.u32 %v3092_v50, %v2787_v49  ;;  %v3127_v46 = vld [vmem:[#allocation17 + $0x50] sm:$0xff]  ;;  %v3141_v48 = vld [vmem:[#allocation17 + $0xc0] sm:$0xff]  ;;  %v3118_v49 = vld [vmem:[#allocation17 + $0x8] sm:$0xff] }
 0x4a5   : > { %v1269_v58 = vpack.c.bf16 %v1262_v56, %v1262_v56  ;;  %1472 = vmatpush.bf16.msrb.mxu1 %v1463_v55  ;;  %v3110_v55 = vld [vmem:[#allocation16 + $0xcc] sm:$0xf]  ;;  %v2869_v56 = vld [vmem:[#allocation16 + $0xd8] sm:$0xf0] }
 0x4a6   : > { %v2872_v57 = vor.u32 %v3110_v55, %v2869_v56  ;;  %v2763_v55 = vld [vmem:[#allocation16] sm:$0xf]  ;;  %v3126_v50 = vld [vmem:[#allocation17 + $0x48] sm:$0xff] }
 0x4a7   : > { %v1444_v59 = vsel %vm1404_vm5, %v1269_v58, 0  ;;  %v2843_v58 = vld [vmem:[#allocation16 + $0xa0] sm:$0xf] }
 0x4a8   : > { %v1417_v60 = vpop.f32.mrf.mxu2  ;;  %1453 = vmatpush.bf16.msrb.mxu0 %v1444_v59  ;;  %2724 = vmatmul.msk.bf16.vlgmr.msrb.gmra.mxu1 %vm1352_vm6, %v1400_v22  ;;  %v3107_v22 = vld [vmem:[#allocation16 + $0xac] sm:$0xf0]  ;;  %v3105_v59 = vld [vmem:[#allocation16 + $0xa4] sm:$0xf] }
 0x4a9   : > { %v1478_v62 = vpack.c.bf16 %v1417_v60, %v1417_v60  ;;  %1604 = vmatpush.bf16.msra.mxu1 %v3084_v1  ;;  %v2844_v60 = vor.u32 %v3107_v22, %v2843_v58  ;;  %v3085_v58 = vld [vmem:[#allocation16 + $0x4] sm:$0xf]  ;;  %v2765_v22 = vld [vmem:[#allocation16 + $0x10] sm:$0xf0] }
 0x4ab   : > { %2723 = vmatmul.msk.bf16.vlgmr.msrb.gmra.mxu0 %vm1352_vm6, %v1399_v61  ;;  %2742 = vmatmul.msk.bf16.vlgmr.msra.gmra.mxu3 %vm1275_vm4, %v1478_v62  ;;  %v2845_v61 = vld [vmem:[#allocation16 + $0xb0] sm:$0xf0]  ;;  %v2851_v62 = vld [vmem:[#allocation16 + $0xa8] sm:$0xf] }
 0x4ac   : > { %1570 = vmatpush.bf16.msra.mxu0 %v3082_v2  ;;  %v2848_v0 = vor.u32 %v3105_v59, %v2845_v61  ;;  %v3106_v2 = vld [vmem:[#allocation16 + $0xac] sm:$0xf]  ;;  %1853 = vmatpush.bf16.msra.mxu2 %v2844_v60  ;;  %v2768_v60 = vor.u32 %v3085_v58, %v2765_v22  ;;  %v2771_v61 = vld [vmem:[#allocation16 + $0x8] sm:$0xf] }
 0x4ad   : > { %1605 = vmatpush.bf16.msra.mxu1 %v3083_v3  ;;  %v2853_v3 = vld [vmem:[#allocation16 + $0xb8] sm:$0xf0] }
 0x4ae   : > { %1866 = vmatpush.bf16.msrb.mxu3 %v2848_v0 }
 0x4b0   : > { %v1419_v63 = vpop.f32.mrf.mxu2  ;;  %1571 = vmatpush.bf16.msra.mxu0 %v3081_v4  ;;  %v2856_v4 = vor.u32 %v3106_v2, %v2853_v3 }
 0x4b1   : > { %1890 = vmatpush.bf16.msrb.mxu1 %v2888_v42  ;;  %v3108_v63 = vld [vmem:[#allocation16 + $0xb4] sm:$0xf0]  ;;  %v2805_v42 = vld [vmem:[#allocation16 + $0x58] sm:$0xf0] }
 0x4b2   : > { %v2852_v1 = vor.u32 %v3108_v63, %v2851_v62  ;;  %v3088_v62 = vld [vmem:[#allocation16 + $0x14] sm:$0xf0]  ;;  %v3086_v63 = vld [vmem:[#allocation16 + $0xc] sm:$0xf] }
 0x4b3   : > { %v2772_v0 = vor.u32 %v3088_v62, %v2771_v61 }
 0x4b4   : > { %1877 = vmatpush.bf16.msrb.mxu0 %v2884_v39  ;;  %v2800_v39 = vor.u32 %v3093_v33, %v2797_v35  ;;  %v3130_v33 = vld [vmem:[#allocation17 + $0x68] sm:$0xff]  ;;  %v3144_v35 = vld [vmem:[#allocation17 + $0xd8] sm:$0xff] }
 0x4b5   : > { %1891 = vmatpush.bf16.msrb.mxu1 %v2872_v57  ;;  %v3087_v57 = vld [vmem:[#allocation16 + $0xc] sm:$0xf0] }
 0x4b6   : > { %v2764_v59 = vor.u32 %v3087_v57, %v2763_v55 }
 0x4b8   : > { %1878 = vmatpush.bf16.msrb.mxu0 %v2868_v54  ;;  %v2789_v54 = vld [vmem:[#allocation16 + $0x38] sm:$0xf0] }
 0x4b9   : > { %1892 = vmatpush.bf16.msrb.mxu1 %v2856_v4  ;;  %v2792_v56 = vor.u32 %v3090_v53, %v2789_v54  ;;  %v3140_v4 = vld [vmem:[#allocation17 + $0xb8] sm:$0xff]  ;;  %v3125_v53 = vld [vmem:[#allocation17 + $0x40] sm:$0xff] }
 0x4bc   : > { %1879 = vmatpush.bf16.msrb.mxu0 %v2852_v1  ;;  %v2773_v1 = vld [vmem:[#allocation16 + $0x18] sm:$0xf0] }
 0x4bd   : > { %v2776_v2 = vor.u32 %v3086_v63, %v2773_v1 }
 0x51b   : > { %v1436_v5 = vpop.f32.mrf.mxu3 }
 0x51c   : > { %v1483_v6 = vpack.c.bf16 %v1436_v5, %v1436_v5  ;;  %v2827_v5 = vld [vmem:[#allocation16 + $0x80] sm:$0xf] }
 0x51e   : > { %2733 = vmatmul.msk.bf16.vlgmr.msrb.gmra.mxu2 %vm1275_vm4, %v1483_v6  ;;  %v3103_v6 = vld [vmem:[#allocation16 + $0x8c] sm:$0xf0] }
 0x523   : > { %v1438_v7 = vpop.f32.mrf.mxu3 }
 0x524   : > { %v3101_v7 = vld [vmem:[#allocation16 + $0x84] sm:$0xf] }
 0x525   : > { %v1474_v8 = vpop.f32.mrf.mxu1 }
 0x526   : > { %v1578_v9 = vpack.c.bf16 %v1474_v8, %v1474_v8  ;;  %v2828_v8 = vor.u32 %v3103_v6, %v2827_v5  ;;  %v3148_v5 = vld [vmem:[#allocation17 + $0xf8] sm:$0xff] }
 0x528   : > { %v1455_v10 = vpop.f32.mrf.mxu0  ;;  %2760 = vmatmul.msk.bf16.vlgmr.msra.gmra.mxu1 %vm1275_vm4, %v1578_v9  ;;  %v2829_v9 = vld [vmem:[#allocation16 + $0x90] sm:$0xf0]  ;;  %1854 = vmatpush.bf16.msra.mxu2 %v2828_v8 }
 0x529   : > { %v1544_v11 = vpack.c.bf16 %v1455_v10, %v1455_v10  ;;  %v2835_v10 = vld [vmem:[#allocation16 + $0x88] sm:$0xf]  ;;  %v3147_v8 = vld [vmem:[#allocation17 + $0xf0] sm:$0xff] }
 0x52b   : > { %2751 = vmatmul.msk.bf16.vlgmr.msra.gmra.mxu0 %vm1275_vm4, %v1544_v11  ;;  %v3104_v11 = vld [vmem:[#allocation16 + $0x94] sm:$0xf0] }
 0x52d   : > { %v1476_v12 = vpop.f32.mrf.mxu1 }
 0x52e   : > { %v1540_v13 = vpop.f32.mrf.mxu3  ;;  %v2832_v12 = vor.u32 %v3101_v7, %v2829_v9  ;;  %v3139_v7 = vld [vmem:[#allocation17 + $0xb0] sm:$0xff] }
 0x530   : > { %v1457_v14 = vpop.f32.mrf.mxu0  ;;  %1867 = vmatpush.bf16.msrb.mxu3 %v2832_v12 }
 0x531   : > { %v3102_v14 = vld [vmem:[#allocation16 + $0x8c] sm:$0xf] }
 0x536   : > { %v1542_v15 = vpop.f32.mrf.mxu3 }
 0x537   : > { %v2837_v15 = vld [vmem:[#allocation16 + $0x98] sm:$0xf0] }
 0x5a1   : > { %v1512_v16 = vpop.f32.mrf.mxu2 }
 0x5a2   : > { %v1541_v18 = vadd.f32 %v1540_v13, %v1512_v16  ;;  %v2836_v13 = vor.u32 %v3104_v11, %v2835_v10  ;;  %v2840_v16 = vor.u32 %v3102_v14, %v2837_v15 }
 0x5a4   : > { %1880 = vmatpush.bf16.msrb.mxu0 %v2836_v13  ;;  %1893 = vmatpush.bf16.msrb.mxu1 %v2840_v16  ;;  %v3295_v16 = vld [vmem:[%s4171_s9] ss:$0 sm:$0xff] }
 0x5a5   : > { %v1607_v17 = vpop.f32.mrf.mxu1 }
 0x5a8   : > { %v1573_v20 = vpop.f32.mrf.mxu0 }
 0x5a9   : > { %v1577_v21 = vadd.f32 %v1573_v20, %v1541_v18  ;;  %v1514_v23 = vpop.f32.mrf.mxu2  ;;  %v3099_v18 = vld [vmem:[#allocation16 + $0x6c] sm:$0xf0]  ;;  %v3097_v20 = vld [vmem:[#allocation16 + $0x64] sm:$0xf] }
 0x5aa   : > { %v2813_v23 = vld [vmem:[#allocation16 + $0x70] sm:$0xf0] }
 0x5ab   : > { %v1611_v25 = vadd.f32 %v1607_v17, %v1577_v21  ;;  %v2811_v17 = vld [vmem:[#allocation16 + $0x60] sm:$0xf] }
 0x5ac   : > { %v2812_v21 = vor.u32 %v3099_v18, %v2811_v17 }
 0x5ad   : > { %v1609_v26 = vpop.f32.mrf.mxu1  ;;  %v1616_v27 = vadd.f32 %v3294_v24, %v1611_v25  ;;  %v2819_v24 = vld [vmem:[#allocation16 + $0x68] sm:$0xf]  ;;  %v3100_v25 = vld [vmem:[#allocation16 + $0x74] sm:$0xf0] }
 0x5ae   : > { %v2816_v26 = vor.u32 %v3097_v20, %v2813_v23  ;;  %1855 = vmatpush.bf16.msra.mxu2 %v2812_v21  ;;  %v3296_v20 = vld [vmem:[%s4172_s10] ss:$0 sm:$0xff] }
 0x5af   : > { %v1617_v28 = vadd.f32 %v1616_v27, %v4042_v52  ;;  %v2820_v27 = vor.u32 %v3100_v25, %v2819_v24  ;;  %v3124_v25 = vld [vmem:[#allocation17 + $0x38] sm:$0xff] }
 0x5b0   : > { %v1575_v29 = vpop.f32.mrf.mxu0  ;;  %1868 = vmatpush.bf16.msrb.mxu3 %v2816_v26  ;;  %v3132_v26 = vld [vmem:[#allocation17 + $0x78] sm:$0xff] }
 0x5b1   : > { %1620 = vadd.xlane.f32.xlu2 %v1617_v28  ;;  %v2821_v29 = vld [vmem:[#allocation16 + $0x78] sm:$0xf0]  ;;  %1881 = vmatpush.bf16.msrb.mxu0 %v2820_v27  ;;  %v3138_v27 = vld [vmem:[#allocation17 + $0xa8] sm:$0xff] }
 0x5b2   : > { %1856 = vmatpush.bf16.msra.mxu2 %v2796_v34  ;;  %v3136_v34 = vld [vmem:[#allocation17 + $0x98] sm:$0xff] }
 0x5b4   : > { %1869 = vmatpush.bf16.msrb.mxu3 %v2800_v39  ;;  %v3135_v39 = vld [vmem:[#allocation17 + $0x90] sm:$0xff] }
 0x5b5   : > { %1882 = vmatpush.bf16.msrb.mxu0 %v2804_v40  ;;  %v3143_v40 = vld [vmem:[#allocation17 + $0xd0] sm:$0xff] }
 0x5b8   : > { %1870 = vmatpush.bf16.msrb.mxu3 %v2784_v51  ;;  %v1681_v51 = vld [vmem:[%s4218_s3] sm:$0xf]  ;;  %s2289_s3 = scalar_lea.sflag [#allocation4], %s3994_s4 }
 0x5b9   : > { %1883 = vmatpush.bf16.msrb.mxu0 %v2788_v38  ;;  %v3117_v38 = vld [vmem:[#allocation17] sm:$0xff]  ;;  %v1685_v54 = vperm.slane %v1681_v51, 2  ;;  %v1686_v55 = vperm.slane %v1681_v51, 3 }
 0x5bc   : > { %1871 = vmatpush.bf16.msrb.mxu3 %v2768_v60  ;;  %v1684_v60 = vperm.slane %v1681_v51, 1 }
 0x5bd   : > { %1884 = vmatpush.bf16.msrb.mxu0 %v2772_v0 }
 0x5c0   : > { %2216 = vmatpush.bf16.msra.mxu3 %v3132_v26 }
 0x5c1   : > { %2229 = vmatpush.bf16.msra.mxu0 %v3140_v4 }
 0x5c5   : > { %2230 = vmatpush.bf16.msra.mxu0 %v3139_v7 }
 0x5c9   : > { %2231 = vmatpush.bf16.msra.mxu0 %v3138_v27 }
 0x624   : > { %v1621_v43 = vpop.xlane.xlu2 %1620 }
 0x625   : > { %v1622_v52 = vmul.f32 %v1621_v43, %v4028_v19  ;;  %v2808_v43 = vor.u32 %v3094_v41, %v2805_v42  ;;  %v3120_v41 = vld [vmem:[#allocation17 + $0x18] sm:$0xff] }
 0x626   : > { %v3128_v42 = vld [vmem:[#allocation17 + $0x58] sm:$0xff] }
 0x627   : > { %v4097_v44 = vsub.f32 %v1617_v28, %v1622_v52  ;;  %v3098_v28 = vld [vmem:[#allocation16 + $0x6c] sm:$0xf]  ;;  %v2779_v52 = vld [vmem:[#allocation16 + $0x20] sm:$0xf] }
 0x628   : > { %v2824_v30 = vor.u32 %v3098_v28, %v2821_v29  ;;  %v3123_v28 = vld [vmem:[#allocation17 + $0x30] sm:$0xff] }
 0x629   : > { %v1624_v45 = vmul.f32 %v4097_v44, %v4097_v44  ;;  %v3131_v29 = vld [vmem:[#allocation17 + $0x70] sm:$0xff] }
 0x62a   : > { %1894 = vmatpush.bf16.msrb.mxu1 %v2824_v30  ;;  %2217 = vmatpush.bf16.msra.mxu3 %v3131_v29  ;;  %v3137_v30 = vld [vmem:[#allocation17 + $0xa0] sm:$0xff] }
 0x62b   : > { %1625 = vadd.xlane.f32.xlu0 %v1624_v45  ;;  %v3091_v45 = vld [vmem:[#allocation16 + $0x2c] sm:$0xf0]  ;;  %2232 = vmatpush.bf16.msra.mxu0 %v3137_v30 }
 0x62c   : > { %v2780_v47 = vor.u32 %v3091_v45, %v2779_v52  ;;  %v3142_v52 = vld [vmem:[#allocation17 + $0xc8] sm:$0xff]  ;;  %v3119_v45 = vld [vmem:[#allocation17 + $0x10] sm:$0xff] }
 0x62e   : > { %1895 = vmatpush.bf16.msrb.mxu1 %v2808_v43  ;;  %1857 = vmatpush.bf16.msra.mxu2 %v2780_v47  ;;  %v3134_v43 = vld [vmem:[#allocation17 + $0x88] sm:$0xff]  ;;  %v3133_v47 = vld [vmem:[#allocation17 + $0x80] sm:$0xff] }
 0x62f   : > { %2218 = vmatpush.bf16.msra.mxu3 %v3130_v33  ;;  %2233 = vmatpush.bf16.msra.mxu0 %v3136_v34 }
 0x632   : > { %1896 = vmatpush.bf16.msrb.mxu1 %v2792_v56  ;;  %1858 = vmatpush.bf16.msra.mxu2 %v2764_v59  ;;  %v1683_v59 = vperm.slane %v1681_v51, 0  ;;  %v3297_v51 = vld [vmem:[%s4219_s22] ss:$0 sm:$0xff] }
 0x633   : > { %2219 = vmatpush.bf16.msra.mxu3 %v3129_v37  ;;  %2234 = vmatpush.bf16.msra.mxu0 %v3135_v39 }
 0x636   : > { %1897 = vmatpush.bf16.msrb.mxu1 %v2776_v2  ;;  %2203 = vmatpush.bf16.msrb.mxu2 %v3124_v25 }
 0x637   : > { %2220 = vmatpush.bf16.msra.mxu3 %v3128_v42  ;;  %2235 = vmatpush.bf16.msra.mxu0 %v3134_v43 }
 0x63a   : > { %2242 = vmatpush.bf16.msra.mxu1 %v3148_v5  ;;  %2204 = vmatpush.bf16.msrb.mxu2 %v3123_v28 }
 0x63b   : > { %2221 = vmatpush.bf16.msra.mxu3 %v3127_v46  ;;  %2236 = vmatpush.bf16.msra.mxu0 %v3133_v47 }
 0x63e   : > { %2243 = vmatpush.bf16.msra.mxu1 %v3147_v8  ;;  %2205 = vmatpush.bf16.msrb.mxu2 %v3122_v32 }
 0x63f   : > { %2222 = vmatpush.bf16.msra.mxu3 %v3126_v50 }
 0x642   : > { %2206 = vmatpush.bf16.msrb.mxu2 %v3121_v36 }
 0x643   : > { %2223 = vmatpush.bf16.msra.mxu3 %v3125_v53 }
 0x646   : > { %2207 = vmatpush.bf16.msrb.mxu2 %v3120_v41 }
 0x64a   : > { %2208 = vmatpush.bf16.msrb.mxu2 %v3119_v45 }
 0x64e   : > { %2209 = vmatpush.bf16.msrb.mxu2 %v3118_v49 }
 0x652   : > { %2210 = vmatpush.bf16.msrb.mxu2 %v3117_v38 }
 0x69e   : > { %v1626_v3 = vpop.xlane.xlu0 %1625 }
 0x69f   : > { %v1627_v6 = vmul.f32 %v1626_v3, %v4028_v19 }
 0x6a1   : > { %v1628_v9 = vadd.f32 1e-12, %v1627_v6 }
 0x6a3   : > { %3320 = vrsqrt.f32 %v1628_v9  ;;  %vm1635_vm8 = vweird.f32 %v1628_v9 }
 0x6a9   : > { %v3321_v10 = vpop.eup %3320 }
 0x6aa   : > { %v1630_v11 = vmul.f32 %v3321_v10, %v1628_v9  ;;  %vm1636_vm7 = vweird.f32 %v3321_v10 }
 0x6ab   : > { %vm1637_vm9 = vmor %vm1635_vm8, %vm1636_vm7 }
 0x6ac   : > { %v1631_v12 = vmul.f32 %v3321_v10, %v1630_v11 }
 0x6ae   : > { %v1632_v13 = vmul.f32 0.5, %v1631_v12 }
 0x6b0   : > { %v1633_v14 = vsub.f32 1.5, %v1632_v13 }
 0x6b2   : > { %v1634_v15 = vmul.f32 %v3321_v10, %v1633_v14 }
 0x6b4   : > { %v1638_v17 = vsel %vm1637_vm9, %v3321_v10, %v1634_v15 }
 0x6b5   : > { %v1639_v18 = vmul.f32 %v1638_v17, %v4097_v44  ;;  %v3146_v44 = vld [vmem:[#allocation17 + $0xe8] sm:$0xff] }
 0x6b6   : > { %2244 = vmatpush.bf16.msra.mxu1 %v3146_v44 }
 0x6b7   : > { %v1643_v21 = vmul.f32 %v3295_v16, %v1639_v18 }
 0x6b9   : > { %v4109_v23 = vadd.f32 %v3296_v20, %v1643_v21 }
 0x6ba   : > { %2245 = vmatpush.bf16.msra.mxu1 %v3145_v31 }
 0x6bb   : > { %v1648_v24 = vpack.c.bf16 %v4109_v23, %v4109_v23 }
 0x6bd   : > { %1859 = vmatmul.bf16.vlgmr.msra.gmra.mxu2 %v1648_v24  ;;  %1872 = vmatmul.bf16.vlgmr.msrb.gmra.mxu3 %v1648_v24 }
 0x6be   : > { %1885 = vmatmul.bf16.vlgmr.msrb.gmra.mxu0 %v1648_v24  ;;  %1898 = vmatmul.bf16.vlgmr.msrb.gmra.mxu1 %v1648_v24 }
 0x6bf   : > { %2246 = vmatpush.bf16.msra.mxu1 %v3144_v35 }
 0x6c3   : > { %2247 = vmatpush.bf16.msra.mxu1 %v3143_v40 }
 0x6c7   : > { %2248 = vmatpush.bf16.msra.mxu1 %v3142_v52 }
 0x6cb   : > { %2249 = vmatpush.bf16.msra.mxu1 %v3141_v48 }
 0x73b   : > { %v1886_v56 = vpop.f32.mrf.mxu0  ;;  %v1899_v57 = vpop.f32.mrf.mxu1 }
 0x73c   : > { %v1887_v58 = vadd.f32 %v1886_v56, %v1685_v54  ;;  %v1900_v22 = vadd.f32 %v1899_v57, %v1686_v55 }
 0x73e   : > { %v1909_v61 = vmul.f32 0.044715, %v1887_v58  ;;  %v1910_v62 = vmul.f32 0.044715, %v1900_v22  ;;  %v1905_v29 = vmul.f32 0.5, %v1887_v58  ;;  %v1906_v31 = vmul.f32 0.5, %v1900_v22 }
 0x740   : > { %v1913_v63 = vmul.f32 %v1909_v61, %v1887_v58  ;;  %v1914_v0 = vmul.f32 %v1910_v62, %v1900_v22  ;;  %v1860_v1 = vpop.f32.mrf.mxu2  ;;  %v1873_v2 = vpop.f32.mrf.mxu3 }
 0x741   : > { %v1861_v3 = vadd.f32 %v1860_v1, %v1683_v59  ;;  %v1874_v4 = vadd.f32 %v1873_v2, %v1684_v60 }
 0x742   : > { %v1917_v5 = vmul.f32 %v1913_v63, %v1887_v58  ;;  %v1918_v6 = vmul.f32 %v1914_v0, %v1900_v22 }
 0x743   : > { %v1907_v7 = vmul.f32 0.044715, %v1861_v3  ;;  %v1908_v8 = vmul.f32 0.044715, %v1874_v4  ;;  %v1888_v9 = vpop.f32.mrf.mxu0  ;;  %v1901_v10 = vpop.f32.mrf.mxu1  ;;  %v1903_v40 = vmul.f32 0.5, %v1861_v3  ;;  %v1904_v42 = vmul.f32 0.5, %v1874_v4 }
 0x744   : > { %v1921_v11 = vadd.f32 %v1917_v5, %v1887_v58  ;;  %v1922_v12 = vadd.f32 %v1918_v6, %v1900_v22  ;;  %v3298_v9 = vld [vmem:[%s4220_s29] ss:$0 sm:$0xff] }
 0x745   : > { %v1911_v13 = vmul.f32 %v1907_v7, %v1861_v3  ;;  %v1912_v14 = vmul.f32 %v1908_v8, %v1874_v4 }
 0x746   : > { %v1925_v15 = vmul.f32 0.7978846, %v1921_v11  ;;  %v1926_v16 = vmul.f32 0.7978846, %v1922_v12  ;;  %v3299_v11 = vld [vmem:[%s4221_s8] ss:$0 sm:$0xff] }
 0x747   : > { %v1915_v17 = vmul.f32 %v1911_v13, %v1861_v3  ;;  %v1916_v18 = vmul.f32 %v1912_v14, %v1874_v4 }
 0x748   : > { %v1862_v20 = vpop.f32.mrf.mxu2  ;;  %v1875_v21 = vpop.f32.mrf.mxu3  ;;  %3322 = vtanh.f32 %v1925_v15 }
 0x749   : > { %3324 = vtanh.f32 %v1926_v16  ;;  %v1919_v24 = vadd.f32 %v1915_v17, %v1861_v3  ;;  %v1920_v25 = vadd.f32 %v1916_v18, %v1874_v4 }
 0x74b   : > { %v1923_v26 = vmul.f32 0.7978846, %v1919_v24  ;;  %v1924_v27 = vmul.f32 0.7978846, %v1920_v25 }
 0x74d   : > { %3326 = vtanh.f32 %v1923_v26 }
 0x74e   : > { %v3323_v44 = vpop.eup %3322  ;;  %3328 = vtanh.f32 %v1924_v27 }
 0x74f   : > { %v3325_v28 = vpop.eup %3324  ;;  %v1933_v30 = vadd.f32 1.0, %v3323_v44 }
 0x750   : > { %v1934_v32 = vadd.f32 1.0, %v3325_v28 }
 0x751   : > { %v1937_v33 = vmul.f32 %v1933_v30, %v1905_v29 }
 0x752   : > { %v1938_v34 = vmul.f32 %v1934_v32, %v1906_v31 }
 0x753   : > { %v3327_v35 = vpop.eup %3326  ;;  %v1941_v36 = vpack.c.bf16 %v1937_v33, %v1937_v33 }
 0x754   : > { %v3329_v37 = vpop.eup %3328  ;;  %v1942_v39 = vpack.c.bf16 %v1938_v34, %v1938_v34  ;;  %v1931_v41 = vadd.f32 1.0, %v3327_v35 }
 0x755   : > { %2237 = vmatmul.bf16.vlgmr.msra.gmra.mxu0 %v1941_v36  ;;  %v1932_v43 = vadd.f32 1.0, %v3329_v37 }
 0x756   : > { %2250 = vmatmul.bf16.vlgmr.msra.gmra.mxu1 %v1942_v39  ;;  %v1935_v52 = vmul.f32 %v1931_v41, %v1903_v40 }
 0x757   : > { %v1936_v45 = vmul.f32 %v1932_v43, %v1904_v42 }
 0x758   : > { %v1939_v46 = vpack.c.bf16 %v1935_v52, %v1935_v52 }
 0x759   : > { %v1940_v47 = vpack.c.bf16 %v1936_v45, %v1936_v45 }
 0x75a   : > { %2211 = vmatmul.bf16.vlgmr.msrb.gmra.mxu2 %v1939_v46 }
 0x75b   : > { %2224 = vmatmul.bf16.vlgmr.msra.gmra.mxu3 %v1940_v47 }
 0x7d2   : > { %v2238_v48 = vpop.f32.mrf.mxu0 }
 0x7d3   : > { %v2251_v49 = vpop.f32.mrf.mxu1 }
 0x7da   : > { %v2240_v50 = vpop.f32.mrf.mxu0 }
 0x7db   : > { %v2253_v38 = vpop.f32.mrf.mxu1 }
 0x7dd   : > { %v2212_v53 = vpop.f32.mrf.mxu2 }
 0x7de   : > { %v2213_v54 = vadd.f32 %v3297_v51, %v2212_v53  ;;  %v2225_v55 = vpop.f32.mrf.mxu3 }
 0x7e0   : > { %v2226_v56 = vadd.f32 %v2225_v55, %v2213_v54 }
 0x7e2   : > { %v2239_v57 = vadd.f32 %v2238_v48, %v2226_v56 }
 0x7e4   : > { %v2252_v58 = vadd.f32 %v2251_v49, %v2239_v57 }
 0x7e5   : > { %v2214_v22 = vpop.f32.mrf.mxu2 }
 0x7e6   : > { %v2227_v59 = vpop.f32.mrf.mxu3  ;;  %v2255_v60 = vadd.f32 %v2252_v58, %v4109_v23 }
 0x7e8   : > { %2258 = vadd.xlane.f32.xlu1 %v2255_v60 }
 0x85b   : > { %v2259_v61 = vpop.xlane.xlu1 %2258 }
 0x85c   : > { %v2260_v62 = vmul.f32 %v2259_v61, %v4028_v19 }
 0x85e   : > { %v2261_v63 = vsub.f32 %v2255_v60, %v2260_v62 }
 0x860   : > { %v2262_v0 = vmul.f32 %v2261_v63, %v2261_v63 }
 0x862   : > { %2263 = vadd.xlane.f32.xlu2 %v2262_v0 }
 0x8d5   : > { %v2264_v1 = vpop.xlane.xlu2 %2263 }
 0x8d6   : > { %v2265_v2 = vmul.f32 %v2264_v1, %v4028_v19 }
 0x8d8   : > { %v2266_v3 = vadd.f32 1e-12, %v2265_v2 }
 0x8da   : > { %3330 = vrsqrt.f32 %v2266_v3  ;;  %vm2273_vm11 = vweird.f32 %v2266_v3 }
 0x8e0   : > { %v3331_v4 = vpop.eup %3330 }
 0x8e1   : > { %v2268_v5 = vmul.f32 %v3331_v4, %v2266_v3  ;;  %vm2274_vm10 = vweird.f32 %v3331_v4 }
 0x8e2   : > { %vm2275_vm12 = vmor %vm2273_vm11, %vm2274_vm10 }
 0x8e3   : > { %v2269_v6 = vmul.f32 %v3331_v4, %v2268_v5 }
 0x8e5   : > { %v2270_v7 = vmul.f32 0.5, %v2269_v6 }
 0x8e7   : > { %v2271_v8 = vsub.f32 1.5, %v2270_v7 }
 0x8e9   : > { %v2272_v23 = vmul.f32 %v3331_v4, %v2271_v8 }
 0x8eb   : > { %v2276_v10 = vsel %vm2275_vm12, %v3331_v4, %v2272_v23 }
 0x8ec   : > { %v2277_v19 = vmul.f32 %v2276_v10, %v2261_v63 }
 0x8ee   : > { %v2281_v12 = vmul.f32 %v3298_v9, %v2277_v19 }
 0x8f0   : > { %v2285_v13 = vadd.f32 %v3299_v11, %v2281_v12 }
 0x8f2   : > { %v2286_v14 = vpack.c.bf16 %v2285_v13, %v2285_v13 }
 0x8f4   : > { %2287 = vst [vmem:[%s726_s6] sm:$0xf] %v2286_v14 }
 0x8f5   : > { %3659 = shalt.err (!%p3656_p8)
}
 0x8f6   : > { %3185 = dma.vmem_to_hbm [thread:$0]  (%p3941_p5), %s2302_s30, 64, %s2304_s21, %s2289_s3  }
 0x8f7 PF: > { %s2315_s4 = sand.u32 1, %s3710_s24   ;;  %p4223_p10 = scmp.ge.s32.totalorder %s3722_s27, 2 }
 0x8f8   : > { %s2316_s29 = scalar_lea.sflag [#allocation4], %s2315_s4 }
 0x8f9   : > { %p3220_p13 = pnand %p4223_p10, %p3945_p6 }
 0x8fb   : > { %p3221_p11 = pneg %p3220_p13 }
 0x8fd   : > { %3705 = dma.done.wait (%p3221_p11), %s2316_s29, 64  }
 0x8fe   : > { %3707 = vsyncadd (%p3221_p11), %s2316_s29, 4294967232  ;;  %s4224_s19 = sld [smem:[#allocation28_spill]]  ;;  %p37_p0 = scmp.ge.s32.totalorder %s3913_s12, 4  }
 0x8ff   : > { %s4225_s26 = sld [smem:[#allocation29_spill]]  ;;  %s4226_s24 = smov %s3714_s25 }
 0x900   : > { %s4228_s27 = smov %s3913_s12  ;;  %39 = sbr.rel (!%p37_p0) target bundleno = 27 (0x1b), region = 178 }
 0x904   : > { %s4227_s25 = smov %s4224_s19 }
 0x905   :  { %2322 = vsyncpa [#allocation3], 1 }
 0x906   :  { %2324 = vsyncpa [#allocation3 + $0x1], 1 }
 0x907   :  { %2325 = vsyncpa [#allocation6], 1 }
 0x908   :  { %2327 = vsyncpa [#allocation6 + $0x1], 1 }
 0x909   :  { %2328 = vsyncpa [#allocation9], 1 }
 0x90a   :  { %2329 = vsyncpa [#allocation12], 1 }
 0x90b   :  { %2330 = vsyncpa [#allocation15], 1 }
 0x90c   :  { %2331 = vsyncpa [#allocation18], 1 }
 0x90d   :  { %2332 = vsyncpa [#allocation4], 1 }
 0x90e   :  { %2334 = vsyncpa [#allocation4 + $0x1], 1 }

</bundles_post_ra>
